<compile_context>
chip_gen: v6e
topology: v6e:2x2x1
jax: 0.10.0
libtpu: 0.0.40
codegen_flags: <defaults>
</compile_context>

<pallas_src>
import jax
import jax.numpy as jnp
from jax.experimental import pallas as pl
from jax.experimental.pallas import tpu as pltpu

INPUT_SIZE = 768
HIDDEN_SIZE = 128
NUM_LAYERS = 2


# --------------------------------------------------------------------------------------
# Tiling helpers
# --------------------------------------------------------------------------------------
def _pick_time_tile(t, b, elem_bytes=2, max_bytes=4 << 20, max_tile=128):
    """Time tile for the projection kernel: divisor of T, (8,128)-legal, VMEM-bounded."""
    legal = [d for d in range(min(t, max_tile), 0, -1)
             if t % d == 0 and (d % 8 == 0 or d == t)]
    if not legal:
        legal = [t]
    for d in legal:
        if b * d * INPUT_SIZE * elem_bytes * 2 <= max_bytes:   # double-buffered x block
            return d
    return legal[-1]


def _pick_time_block(t, max_blk=16):
    """Timesteps fused per recurrent grid step (divisor of T, capped to limit unroll/vregs)."""
    for c in range(min(t, max_blk), 0, -1):
        if t % c == 0:
            return c
    return 1


def _pick_batch_block(b):
    """Split batch into 2 blocks (v7x second TensorCore) only when (8,128) legality allows."""
    if b >= 16 and b % 2 == 0 and (b // 2) % 8 == 0:
        return b // 2
    return b


# --------------------------------------------------------------------------------------
# Kernel 1: hoisted layer-0 input projection, written time-major
#   p[t, b, :] = x[b, t, :] @ W_ih0^T + (b_ih0 + b_hh0)        (stored bf16)
# --------------------------------------------------------------------------------------
def proj_kernel(x_ref, w_ref, b_ref, o_ref):
    bblk, ttile, d = x_ref.shape
    x2 = x_ref[...].reshape(bblk * ttile, d)                       # bf16, rows ordered (b, t)
    y = jnp.dot(x2, w_ref[...], preferred_element_type=jnp.float32) + b_ref[...]
    y = y.reshape(bblk, ttile, HIDDEN_SIZE).astype(o_ref.dtype)
    # Static per-timestep stores write the block time-major (avoids a 3-D transpose).
    for t in range(ttile):
        o_ref[t] = y[:, t, :]


def input_projection(x_bf16, wih0_t_bf16, b0):
    """x_bf16: (B, T, 768) bf16. Returns p time-major (T, B, 128) bf16, bias folded in."""
    B, T, D = x_bf16.shape
    ttile = _pick_time_tile(T, B)
    return pl.pallas_call(
        proj_kernel,
        out_shape=jax.ShapeDtypeStruct((T, B, HIDDEN_SIZE), jnp.bfloat16),
        grid_spec=pltpu.PrefetchScalarGridSpec(
            num_scalar_prefetch=0,
            grid=(T // ttile,),
            in_specs=[
                pl.BlockSpec((B, ttile, D), lambda ti: (0, ti, 0)),          # x time block
                pl.BlockSpec((D, HIDDEN_SIZE), lambda ti: (0, 0)),           # W_ih_l0^T (bf16)
                pl.BlockSpec((1, HIDDEN_SIZE), lambda ti: (0, 0)),           # b_ih_l0 + b_hh_l0
            ],
            out_specs=pl.BlockSpec((ttile, B, HIDDEN_SIZE), lambda ti: (ti, 0, 0)),
        ),
        compiler_params=pltpu.CompilerParams(
            dimension_semantics=("parallel",),
        ),
    )(x_bf16, wih0_t_bf16, b0)


# --------------------------------------------------------------------------------------
# Kernel 2: time-blocked, layer-pipelined recurrence + last-step FC + softmax
# --------------------------------------------------------------------------------------
def rnn_kernel(p_ref,      # (tblk, bblk, 128) bf16  precomputed layer-0 pre-activations
               whh0_ref,   # (128, 128) bf16  W_hh_l0^T
               wih1_ref,   # (128, 128) bf16  W_ih_l1^T
               whh1_ref,   # (128, 128) bf16  W_hh_l1^T
               b1_ref,     # (1, 128)   f32   b_ih_l1 + b_hh_l1
               wfc_ref,    # (128, C)   f32   fc weight^T
               bfc_ref,    # (1, C)     f32   fc bias
               out_ref,    # (bblk, C)  f32
               h0_scr,     # VMEM (bblk, 128) f32     layer-0 hidden state
               h1_scr,     # VMEM (bblk, 128) f32     layer-1 hidden state
               stash_scr,  # VMEM (tblk, bblk, 128) f32  per-step h0, then layer-1 input term
               ):
    tblk, bblk, _ = p_ref.shape
    ti = pl.program_id(1)

    @pl.when(ti == 0)
    def _():
        h0_scr[...] = jnp.zeros_like(h0_scr)
        h1_scr[...] = jnp.zeros_like(h1_scr)

    # Hoisted loop-invariant weight loads (bf16 => 4 vregs each).
    whh0 = whh0_ref[...]
    whh1 = whh1_ref[...]

    # ---- layer-0 recurrence over the time block (serial; tiny per-step dot) ----
    h0 = h0_scr[...]
    for s in range(tblk):                                   # fully unrolled, static indices
        h0 = jnp.tanh(p_ref[s].astype(jnp.float32)
                      + jnp.dot(h0.astype(jnp.bfloat16), whh0,
                                preferred_element_type=jnp.float32))
        stash_scr[s] = h0
    h0_scr[...] = h0

    # ---- layer-1 input term for all tblk steps in ONE MXU-friendly matmul (M = tblk*bblk) ----
    h0_all = stash_scr[...].reshape(tblk * bblk, HIDDEN_SIZE).astype(jnp.bfloat16)
    q = (jnp.dot(h0_all, wih1_ref[...], preferred_element_type=jnp.float32)
         + b1_ref[...]).reshape(tblk, bblk, HIDDEN_SIZE)
    stash_scr[...] = q

    # ---- layer-1 recurrence ----
    h1 = h1_scr[...]
    for s in range(tblk):
        h1 = jnp.tanh(stash_scr[s]
                      + jnp.dot(h1.astype(jnp.bfloat16), whh1,
                                preferred_element_type=jnp.float32))
    h1_scr[...] = h1

    @pl.when(ti == pl.num_programs(1) - 1)
    def _():
        # last_output -> dropout (identity, eval mode) -> fc -> softmax(dim=1)
        # TODO(synk): nn.Dropout(0.5) would mask/scale in train mode; identity here (inference).
        logits = (jnp.dot(h1, wfc_ref[...], preferred_element_type=jnp.float32)
                  + bfc_ref[...])
        m = jnp.max(logits, axis=1, keepdims=True)
        e = jnp.exp(logits - m)
        out_ref[...] = e / jnp.sum(e, axis=1, keepdims=True)


def method_rnn_forward(x, params, attention_mask=None):
    """x: (B, T, 768) float32. attention_mask is unused (parity with the PyTorch forward).
    Returns softmax probabilities (B, num_classes)."""
    B, T, D = x.shape
    assert D == INPUT_SIZE
    num_classes = params["wfc_t"].shape[1]

    # 1) Hoisted layer-0 input projection; bf16 MXU operands, f32 accumulation,
    #    output written directly time-major in bf16 (no standalone HBM transpose).
    p_tm = input_projection(x.astype(jnp.bfloat16),
                            params["wih0_t"].astype(jnp.bfloat16),
                            params["b0"])

    # 2) Time-blocked recurrence.
    tblk = _pick_time_block(T)
    bblk = _pick_batch_block(B)
    nb, nt = B // bblk, T // tblk
    const = lambda bi, ti: (0, 0)

    out = pl.pallas_call(
        rnn_kernel,
        out_shape=jax.ShapeDtypeStruct((B, num_classes), jnp.float32),
        grid_spec=pltpu.PrefetchScalarGridSpec(
            num_scalar_prefetch=0,
            grid=(nb, nt),
            in_specs=[
                pl.BlockSpec((tblk, bblk, HIDDEN_SIZE), lambda bi, ti: (ti, bi, 0)),  # p block
                pl.BlockSpec((HIDDEN_SIZE, HIDDEN_SIZE), const),                      # W_hh_l0^T
                pl.BlockSpec((HIDDEN_SIZE, HIDDEN_SIZE), const),                      # W_ih_l1^T
                pl.BlockSpec((HIDDEN_SIZE, HIDDEN_SIZE), const),                      # W_hh_l1^T
                pl.BlockSpec((1, HIDDEN_SIZE), const),                                # b1
                pl.BlockSpec((HIDDEN_SIZE, num_classes), const),                      # W_fc^T
                pl.BlockSpec((1, num_classes), const),                                # b_fc
            ],
            out_specs=pl.BlockSpec((bblk, num_classes), lambda bi, ti: (bi, 0)),
            scratch_shapes=[
                pltpu.VMEM((bblk, HIDDEN_SIZE), jnp.float32),
                pltpu.VMEM((bblk, HIDDEN_SIZE), jnp.float32),
                pltpu.VMEM((tblk, bblk, HIDDEN_SIZE), jnp.float32),
            ],
        ),
        compiler_params=pltpu.CompilerParams(
            # batch blocks independent (v7x 2 TCs); time is a sequential recurrence.
            dimension_semantics=("parallel", "arbitrary"),
        ),
    )(p_tm,
      params["whh0_t"].astype(jnp.bfloat16),
      params["wih1_t"].astype(jnp.bfloat16),
      params["whh1_t"].astype(jnp.bfloat16),
      params["b1"], params["wfc_t"], params["bfc"])
    return out


def init_params(key, num_classes):
    """Deterministic synthetic parameters with PyTorch-equivalent shapes (stored pre-transposed)."""
    ks = jax.random.split(key, 10)
    s = 1.0 / (HIDDEN_SIZE ** 0.5)
    u = lambda k, shape: jax.random.uniform(k, shape, jnp.float32, -s, s)
    return {
        # nn.RNN layer 0: weight_ih_l0 (128,768) -> stored transposed (768,128)
        "wih0_t": u(ks[0], (INPUT_SIZE, HIDDEN_SIZE)),
        "whh0_t": u(ks[1], (HIDDEN_SIZE, HIDDEN_SIZE)),
        "b0": (u(ks[2], (1, HIDDEN_SIZE)) + u(ks[3], (1, HIDDEN_SIZE))),   # b_ih_l0 + b_hh_l0
        # nn.RNN layer 1
        "wih1_t": u(ks[4], (HIDDEN_SIZE, HIDDEN_SIZE)),
        "whh1_t": u(ks[5], (HIDDEN_SIZE, HIDDEN_SIZE)),
        "b1": (u(ks[6], (1, HIDDEN_SIZE)) + u(ks[7], (1, HIDDEN_SIZE))),   # b_ih_l1 + b_hh_l1
        # fc: weight (C,128) -> stored transposed (128,C)
        "wfc_t": u(ks[8], (HIDDEN_SIZE, num_classes)),
        "bfc": u(ks[9], (1, num_classes)),
    }


def reference_forward(x, params):
    """Pure-JAX f32 reference (lax.scan) of the same forward pass."""
    def step(carry, x_t):
        h0, h1 = carry
        h0 = jnp.tanh(x_t @ params["wih0_t"] + h0 @ params["whh0_t"] + params["b0"])
        h1 = jnp.tanh(h0 @ params["wih1_t"] + h1 @ params["whh1_t"] + params["b1"])
        return (h0, h1), None
    B = x.shape[0]
    h0 = jnp.zeros((B, HIDDEN_SIZE), jnp.float32)
    h1 = jnp.zeros((B, HIDDEN_SIZE), jnp.float32)
    (h0, h1), _ = jax.lax.scan(step, (h0, h1), jnp.transpose(x, (1, 0, 2)))
    logits = h1 @ params["wfc_t"] + params["bfc"]
    return jax.nn.softmax(logits, axis=1)


if __name__ == "__main__":
    key = jax.random.PRNGKey(0)
    k_x, k_p = jax.random.split(key)

    B, T, num_classes = 8, 8, 5
    x = jax.random.normal(k_x, (B, T, INPUT_SIZE), jnp.float32)
    attention_mask = jnp.ones((B, T), jnp.int32)   # unused by forward(), kept for signature parity

    params = init_params(k_p, num_classes)

    y_pred = jax.jit(method_rnn_forward)(x, params, attention_mask)
    y_pred = jax.block_until_ready(y_pred)

    y_ref = reference_forward(x, params)

    assert y_pred.shape == (B, num_classes)
    assert jnp.allclose(jnp.sum(y_pred, axis=1), 1.0, atol=1e-4)
    # bf16 MXU operands with f32 accumulation vs. the pure-f32 reference.
    max_err = float(jnp.max(jnp.abs(y_pred - y_ref)))
    assert jnp.allclose(y_pred, y_ref, rtol=2e-2, atol=2e-2), max_err

    print("KERNEL_OK")
</pallas_src>

<mosaic_0001>
module attributes {stable_mosaic.version = 11 : i64} {
  func.func @proj_kernel(%arg0: i32, %arg1: memref<8x8x768xbf16, #tpu.memory_space<vmem>>, %arg2: memref<768x128xbf16, #tpu.memory_space<vmem>>, %arg3: memref<1x128xf32, #tpu.memory_space<vmem>>, %arg4: memref<8x8x128xbf16, #tpu.memory_space<vmem>>) attributes {dimension_semantics = [#tpu.dimension_semantics<parallel>], iteration_bounds = array<i64: 1>, scalar_prefetch = 0 : i64, scratch_operands = 0 : i64, tpu.core_type = #tpu.core_type<tc>, window_params = [{transform_indices = @transform_0, window_bounds = array<i64: 8, 8, 768>}, {pipeline_mode = #tpu.pipeline_mode<synchronous>, transform_indices = @transform_1, window_bounds = array<i64: 768, 128>}, {pipeline_mode = #tpu.pipeline_mode<synchronous>, transform_indices = @transform_2, window_bounds = array<i64: 1, 128>}, {transform_indices = @transform_3, window_bounds = array<i64: 8, 8, 128>}]} {
    %c0 = arith.constant 0 : index
    %c0_0 = arith.constant 0 : index
    %c0_1 = arith.constant 0 : index
    %0 = vector.load %arg1[%c0, %c0_0, %c0_1] : memref<8x8x768xbf16, #tpu.memory_space<vmem>>, vector<8x8x768xbf16>
    %1 = vector.shape_cast %0 : vector<8x8x768xbf16> to vector<64x768xbf16>
    %c0_2 = arith.constant 0 : index
    %c0_3 = arith.constant 0 : index
    %2 = vector.load %arg2[%c0_2, %c0_3] : memref<768x128xbf16, #tpu.memory_space<vmem>>, vector<768x128xbf16>
    %cst = arith.constant dense<0.000000e+00> : vector<64x128xf32>
    %3 = tpu.matmul %1, %2, %cst {dimension_numbers = #tpu.dot_dimension_numbers<[1], [0], [0], [1], [0, 0, 1, 1], [], []>} : vector<64x768xbf16>, vector<768x128xbf16>, vector<64x128xf32> -> vector<64x128xf32>
    %c0_4 = arith.constant 0 : index
    %c0_5 = arith.constant 0 : index
    %4 = vector.load %arg3[%c0_4, %c0_5] : memref<1x128xf32, #tpu.memory_space<vmem>>, vector<1x128xf32>
    %5 = vector.broadcast %4 : vector<1x128xf32> to vector<64x128xf32>
    %6 = arith.addf %3, %5 : vector<64x128xf32>
    %7 = vector.shape_cast %6 : vector<64x128xf32> to vector<8x8x128xf32>
    %8 = arith.truncf %7 : vector<8x8x128xf32> to vector<8x8x128xbf16>
    %9 = vector.extract_strided_slice %8 {offsets = [0, 0, 0], sizes = [8, 1, 128], strides = [1, 1, 1]} : vector<8x8x128xbf16> to vector<8x1x128xbf16>
    %10 = vector.shape_cast %9 : vector<8x1x128xbf16> to vector<8x128xbf16>
    %c0_6 = arith.constant 0 : index
    %c0_7 = arith.constant 0 : index
    %c0_8 = arith.constant 0 : index
    %11 = vector.load %arg4[%c0_6, %c0_7, %c0_8] : memref<8x8x128xbf16, #tpu.memory_space<vmem>>, vector<1x8x128xbf16>
    %12 = vector.shape_cast %11 : vector<1x8x128xbf16> to vector<8x128xbf16>
    %13 = vector.shape_cast %10 : vector<8x128xbf16> to vector<1x8x128xbf16>
    tpu.vector_store %arg4[%c0_6, %c0_7, %c0_8], %13 {strides = array<i32>} : memref<8x8x128xbf16, #tpu.memory_space<vmem>>, vector<1x8x128xbf16>,
    %14 = vector.extract_strided_slice %8 {offsets = [0, 1, 0], sizes = [8, 1, 128], strides = [1, 1, 1]} : vector<8x8x128xbf16> to vector<8x1x128xbf16>
    %15 = vector.shape_cast %14 : vector<8x1x128xbf16> to vector<8x128xbf16>
    %c1 = arith.constant 1 : index
    %c0_9 = arith.constant 0 : index
    %c0_10 = arith.constant 0 : index
    %16 = vector.load %arg4[%c1, %c0_9, %c0_10] : memref<8x8x128xbf16, #tpu.memory_space<vmem>>, vector<1x8x128xbf16>
    %17 = vector.shape_cast %16 : vector<1x8x128xbf16> to vector<8x128xbf16>
    %18 = vector.shape_cast %15 : vector<8x128xbf16> to vector<1x8x128xbf16>
    tpu.vector_store %arg4[%c1, %c0_9, %c0_10], %18 {strides = array<i32>} : memref<8x8x128xbf16, #tpu.memory_space<vmem>>, vector<1x8x128xbf16>,
    %19 = vector.extract_strided_slice %8 {offsets = [0, 2, 0], sizes = [8, 1, 128], strides = [1, 1, 1]} : vector<8x8x128xbf16> to vector<8x1x128xbf16>
    %20 = vector.shape_cast %19 : vector<8x1x128xbf16> to vector<8x128xbf16>
    %c2 = arith.constant 2 : index
    %c0_11 = arith.constant 0 : index
    %c0_12 = arith.constant 0 : index
    %21 = vector.load %arg4[%c2, %c0_11, %c0_12] : memref<8x8x128xbf16, #tpu.memory_space<vmem>>, vector<1x8x128xbf16>
    %22 = vector.shape_cast %21 : vector<1x8x128xbf16> to vector<8x128xbf16>
    %23 = vector.shape_cast %20 : vector<8x128xbf16> to vector<1x8x128xbf16>
    tpu.vector_store %arg4[%c2, %c0_11, %c0_12], %23 {strides = array<i32>} : memref<8x8x128xbf16, #tpu.memory_space<vmem>>, vector<1x8x128xbf16>,
    %24 = vector.extract_strided_slice %8 {offsets = [0, 3, 0], sizes = [8, 1, 128], strides = [1, 1, 1]} : vector<8x8x128xbf16> to vector<8x1x128xbf16>
    %25 = vector.shape_cast %24 : vector<8x1x128xbf16> to vector<8x128xbf16>
    %c3 = arith.constant 3 : index
    %c0_13 = arith.constant 0 : index
    %c0_14 = arith.constant 0 : index
    %26 = vector.load %arg4[%c3, %c0_13, %c0_14] : memref<8x8x128xbf16, #tpu.memory_space<vmem>>, vector<1x8x128xbf16>
    %27 = vector.shape_cast %26 : vector<1x8x128xbf16> to vector<8x128xbf16>
    %28 = vector.shape_cast %25 : vector<8x128xbf16> to vector<1x8x128xbf16>
    tpu.vector_store %arg4[%c3, %c0_13, %c0_14], %28 {strides = array<i32>} : memref<8x8x128xbf16, #tpu.memory_space<vmem>>, vector<1x8x128xbf16>,
    %29 = vector.extract_strided_slice %8 {offsets = [0, 4, 0], sizes = [8, 1, 128], strides = [1, 1, 1]} : vector<8x8x128xbf16> to vector<8x1x128xbf16>
    %30 = vector.shape_cast %29 : vector<8x1x128xbf16> to vector<8x128xbf16>
    %c4 = arith.constant 4 : index
    %c0_15 = arith.constant 0 : index
    %c0_16 = arith.constant 0 : index
    %31 = vector.load %arg4[%c4, %c0_15, %c0_16] : memref<8x8x128xbf16, #tpu.memory_space<vmem>>, vector<1x8x128xbf16>
    %32 = vector.shape_cast %31 : vector<1x8x128xbf16> to vector<8x128xbf16>
    %33 = vector.shape_cast %30 : vector<8x128xbf16> to vector<1x8x128xbf16>
    tpu.vector_store %arg4[%c4, %c0_15, %c0_16], %33 {strides = array<i32>} : memref<8x8x128xbf16, #tpu.memory_space<vmem>>, vector<1x8x128xbf16>,
    %34 = vector.extract_strided_slice %8 {offsets = [0, 5, 0], sizes = [8, 1, 128], strides = [1, 1, 1]} : vector<8x8x128xbf16> to vector<8x1x128xbf16>
    %35 = vector.shape_cast %34 : vector<8x1x128xbf16> to vector<8x128xbf16>
    %c5 = arith.constant 5 : index
    %c0_17 = arith.constant 0 : index
    %c0_18 = arith.constant 0 : index
    %36 = vector.load %arg4[%c5, %c0_17, %c0_18] : memref<8x8x128xbf16, #tpu.memory_space<vmem>>, vector<1x8x128xbf16>
    %37 = vector.shape_cast %36 : vector<1x8x128xbf16> to vector<8x128xbf16>
    %38 = vector.shape_cast %35 : vector<8x128xbf16> to vector<1x8x128xbf16>
    tpu.vector_store %arg4[%c5, %c0_17, %c0_18], %38 {strides = array<i32>} : memref<8x8x128xbf16, #tpu.memory_space<vmem>>, vector<1x8x128xbf16>,
    %39 = vector.extract_strided_slice %8 {offsets = [0, 6, 0], sizes = [8, 1, 128], strides = [1, 1, 1]} : vector<8x8x128xbf16> to vector<8x1x128xbf16>
    %40 = vector.shape_cast %39 : vector<8x1x128xbf16> to vector<8x128xbf16>
    %c6 = arith.constant 6 : index
    %c0_19 = arith.constant 0 : index
    %c0_20 = arith.constant 0 : index
    %41 = vector.load %arg4[%c6, %c0_19, %c0_20] : memref<8x8x128xbf16, #tpu.memory_space<vmem>>, vector<1x8x128xbf16>
    %42 = vector.shape_cast %41 : vector<1x8x128xbf16> to vector<8x128xbf16>
    %43 = vector.shape_cast %40 : vector<8x128xbf16> to vector<1x8x128xbf16>
    tpu.vector_store %arg4[%c6, %c0_19, %c0_20], %43 {strides = array<i32>} : memref<8x8x128xbf16, #tpu.memory_space<vmem>>, vector<1x8x128xbf16>,
    %44 = vector.extract_strided_slice %8 {offsets = [0, 7, 0], sizes = [8, 1, 128], strides = [1, 1, 1]} : vector<8x8x128xbf16> to vector<8x1x128xbf16>
    %45 = vector.shape_cast %44 : vector<8x1x128xbf16> to vector<8x128xbf16>
    %c7 = arith.constant 7 : index
    %c0_21 = arith.constant 0 : index
    %c0_22 = arith.constant 0 : index
    %46 = vector.load %arg4[%c7, %c0_21, %c0_22] : memref<8x8x128xbf16, #tpu.memory_space<vmem>>, vector<1x8x128xbf16>
    %47 = vector.shape_cast %46 : vector<1x8x128xbf16> to vector<8x128xbf16>
    %48 = vector.shape_cast %45 : vector<8x128xbf16> to vector<1x8x128xbf16>
    tpu.vector_store %arg4[%c7, %c0_21, %c0_22], %48 {strides = array<i32>} : memref<8x8x128xbf16, #tpu.memory_space<vmem>>, vector<1x8x128xbf16>,
    return
  }
  func.func @transform_0(%arg0: i32) -> (i32, i32, i32) {
    %c0_i32 = arith.constant 0 : i32
    %c0_i32_0 = arith.constant 0 : i32
    %c0_i32_1 = arith.constant 0 : i32
    return %c0_i32, %arg0, %c0_i32_0 : i32, i32, i32
  }
  func.func @transform_1(%arg0: i32) -> (i32, i32) {
    %c0_i32 = arith.constant 0 : i32
    %c0_i32_0 = arith.constant 0 : i32
    %c0_i32_1 = arith.constant 0 : i32
    return %c0_i32, %c0_i32_0 : i32, i32
  }
  func.func @transform_2(%arg0: i32) -> (i32, i32) {
    %c0_i32 = arith.constant 0 : i32
    %c0_i32_0 = arith.constant 0 : i32
    %c0_i32_1 = arith.constant 0 : i32
    return %c0_i32, %c0_i32_0 : i32, i32
  }
  func.func @transform_3(%arg0: i32) -> (i32, i32, i32) {
    %c0_i32 = arith.constant 0 : i32
    %c0_i32_0 = arith.constant 0 : i32
    %c0_i32_1 = arith.constant 0 : i32
    return %arg0, %c0_i32, %c0_i32_0 : i32, i32, i32
  }
}

module attributes {stable_mosaic.version = 11 : i64} {
  func.func @rnn_kernel(%arg0: i32, %arg1: i32, %arg2: memref<8x8x128xbf16, #tpu.memory_space<vmem>>, %arg3: memref<128x128xbf16, #tpu.memory_space<vmem>>, %arg4: memref<128x128xbf16, #tpu.memory_space<vmem>>, %arg5: memref<128x128xbf16, #tpu.memory_space<vmem>>, %arg6: memref<1x128xf32, #tpu.memory_space<vmem>>, %arg7: memref<128x5xf32, #tpu.memory_space<vmem>>, %arg8: memref<1x5xf32, #tpu.memory_space<vmem>>, %arg9: memref<8x5xf32, #tpu.memory_space<vmem>>, %arg10: memref<8x128xf32, #tpu.memory_space<vmem>>, %arg11: memref<8x128xf32, #tpu.memory_space<vmem>>, %arg12: memref<8x8x128xf32, #tpu.memory_space<vmem>>) attributes {dimension_semantics = [#tpu.dimension_semantics<parallel>, #tpu.dimension_semantics<arbitrary>], iteration_bounds = array<i64: 1, 1>, scalar_prefetch = 0 : i64, scratch_operands = 3 : i64, tpu.core_type = #tpu.core_type<tc>, window_params = [{transform_indices = @transform_0, window_bounds = array<i64: 8, 8, 128>}, {pipeline_mode = #tpu.pipeline_mode<synchronous>, transform_indices = @transform_1, window_bounds = array<i64: 128, 128>}, {pipeline_mode = #tpu.pipeline_mode<synchronous>, transform_indices = @transform_2, window_bounds = array<i64: 128, 128>}, {pipeline_mode = #tpu.pipeline_mode<synchronous>, transform_indices = @transform_3, window_bounds = array<i64: 128, 128>}, {pipeline_mode = #tpu.pipeline_mode<synchronous>, transform_indices = @transform_4, window_bounds = array<i64: 1, 128>}, {pipeline_mode = #tpu.pipeline_mode<synchronous>, transform_indices = @transform_5, window_bounds = array<i64: 128, 5>}, {pipeline_mode = #tpu.pipeline_mode<synchronous>, transform_indices = @transform_6, window_bounds = array<i64: 1, 5>}, {transform_indices = @transform_7, window_bounds = array<i64: 8, 5>}]} {
    %c0_i32 = arith.constant 0 : i32
    %0 = arith.cmpi eq, %arg1, %c0_i32 : i32
    %1 = arith.extui %0 : i1 to i32
    %c0_i32_0 = arith.constant 0 : i32
    %2 = arith.cmpi ne, %1, %c0_i32_0 : i32
    scf.if %2 {
      %cst_105 = arith.constant 0.000000e+00 : f32
      %150 = vector.broadcast %cst_105 : f32 to vector<8x128xf32>
      %c0_106 = arith.constant 0 : index
      %c0_107 = arith.constant 0 : index
      %151 = vector.load %arg10[%c0_106, %c0_107] : memref<8x128xf32, #tpu.memory_space<vmem>>, vector<8x128xf32>
      tpu.vector_store %arg10[%c0_106, %c0_107], %150 {strides = array<i32>} : memref<8x128xf32, #tpu.memory_space<vmem>>, vector<8x128xf32>,
      %cst_108 = arith.constant 0.000000e+00 : f32
      %152 = vector.broadcast %cst_108 : f32 to vector<8x128xf32>
      %c0_109 = arith.constant 0 : index
      %c0_110 = arith.constant 0 : index
      %153 = vector.load %arg11[%c0_109, %c0_110] : memref<8x128xf32, #tpu.memory_space<vmem>>, vector<8x128xf32>
      tpu.vector_store %arg11[%c0_109, %c0_110], %152 {strides = array<i32>} : memref<8x128xf32, #tpu.memory_space<vmem>>, vector<8x128xf32>,
    } else {
    }
    %c0 = arith.constant 0 : index
    %c0_1 = arith.constant 0 : index
    %3 = vector.load %arg3[%c0, %c0_1] : memref<128x128xbf16, #tpu.memory_space<vmem>>, vector<128x128xbf16>
    %c0_2 = arith.constant 0 : index
    %c0_3 = arith.constant 0 : index
    %4 = vector.load %arg5[%c0_2, %c0_3] : memref<128x128xbf16, #tpu.memory_space<vmem>>, vector<128x128xbf16>
    %c0_4 = arith.constant 0 : index
    %c0_5 = arith.constant 0 : index
    %5 = vector.load %arg10[%c0_4, %c0_5] : memref<8x128xf32, #tpu.memory_space<vmem>>, vector<8x128xf32>
    %c0_6 = arith.constant 0 : index
    %c0_7 = arith.constant 0 : index
    %c0_8 = arith.constant 0 : index
    %6 = vector.load %arg2[%c0_6, %c0_7, %c0_8] : memref<8x8x128xbf16, #tpu.memory_space<vmem>>, vector<1x8x128xbf16>
    %7 = vector.shape_cast %6 : vector<1x8x128xbf16> to vector<8x128xbf16>
    %8 = arith.extf %7 : vector<8x128xbf16> to vector<8x128xf32>
    %9 = arith.truncf %5 : vector<8x128xf32> to vector<8x128xbf16>
    %cst = arith.constant dense<0.000000e+00> : vector<8x128xf32>
    %10 = tpu.matmul %9, %3, %cst {dimension_numbers = #tpu.dot_dimension_numbers<[1], [0], [0], [1], [0, 0, 1, 1], [], []>} : vector<8x128xbf16>, vector<128x128xbf16>, vector<8x128xf32> -> vector<8x128xf32>
    %11 = arith.addf %8, %10 : vector<8x128xf32>
    %12 = math.tanh %11 : vector<8x128xf32>
    %c0_9 = arith.constant 0 : index
    %c0_10 = arith.constant 0 : index
    %c0_11 = arith.constant 0 : index
    %13 = vector.load %arg12[%c0_9, %c0_10, %c0_11] : memref<8x8x128xf32, #tpu.memory_space<vmem>>, vector<1x8x128xf32>
    %14 = vector.shape_cast %13 : vector<1x8x128xf32> to vector<8x128xf32>
    %15 = vector.shape_cast %12 : vector<8x128xf32> to vector<1x8x128xf32>
    tpu.vector_store %arg12[%c0_9, %c0_10, %c0_11], %15 {strides = array<i32>} : memref<8x8x128xf32, #tpu.memory_space<vmem>>, vector<1x8x128xf32>,
    %c1 = arith.constant 1 : index
    %c0_12 = arith.constant 0 : index
    %c0_13 = arith.constant 0 : index
    %16 = vector.load %arg2[%c1, %c0_12, %c0_13] : memref<8x8x128xbf16, #tpu.memory_space<vmem>>, vector<1x8x128xbf16>
    %17 = vector.shape_cast %16 : vector<1x8x128xbf16> to vector<8x128xbf16>
    %18 = arith.extf %17 : vector<8x128xbf16> to vector<8x128xf32>
    %19 = arith.truncf %12 : vector<8x128xf32> to vector<8x128xbf16>
    %cst_14 = arith.constant dense<0.000000e+00> : vector<8x128xf32>
    %20 = tpu.matmul %19, %3, %cst_14 {dimension_numbers = #tpu.dot_dimension_numbers<[1], [0], [0], [1], [0, 0, 1, 1], [], []>} : vector<8x128xbf16>, vector<128x128xbf16>, vector<8x128xf32> -> vector<8x128xf32>
    %21 = arith.addf %18, %20 : vector<8x128xf32>
    %22 = math.tanh %21 : vector<8x128xf32>
    %c1_15 = arith.constant 1 : index
    %c0_16 = arith.constant 0 : index
    %c0_17 = arith.constant 0 : index
    %23 = vector.load %arg12[%c1_15, %c0_16, %c0_17] : memref<8x8x128xf32, #tpu.memory_space<vmem>>, vector<1x8x128xf32>
    %24 = vector.shape_cast %23 : vector<1x8x128xf32> to vector<8x128xf32>
    %25 = vector.shape_cast %22 : vector<8x128xf32> to vector<1x8x128xf32>
    tpu.vector_store %arg12[%c1_15, %c0_16, %c0_17], %25 {strides = array<i32>} : memref<8x8x128xf32, #tpu.memory_space<vmem>>, vector<1x8x128xf32>,
    %c2 = arith.constant 2 : index
    %c0_18 = arith.constant 0 : index
    %c0_19 = arith.constant 0 : index
    %26 = vector.load %arg2[%c2, %c0_18, %c0_19] : memref<8x8x128xbf16, #tpu.memory_space<vmem>>, vector<1x8x128xbf16>
    %27 = vector.shape_cast %26 : vector<1x8x128xbf16> to vector<8x128xbf16>
    %28 = arith.extf %27 : vector<8x128xbf16> to vector<8x128xf32>
    %29 = arith.truncf %22 : vector<8x128xf32> to vector<8x128xbf16>
    %cst_20 = arith.constant dense<0.000000e+00> : vector<8x128xf32>
    %30 = tpu.matmul %29, %3, %cst_20 {dimension_numbers = #tpu.dot_dimension_numbers<[1], [0], [0], [1], [0, 0, 1, 1], [], []>} : vector<8x128xbf16>, vector<128x128xbf16>, vector<8x128xf32> -> vector<8x128xf32>
    %31 = arith.addf %28, %30 : vector<8x128xf32>
    %32 = math.tanh %31 : vector<8x128xf32>
    %c2_21 = arith.constant 2 : index
    %c0_22 = arith.constant 0 : index
    %c0_23 = arith.constant 0 : index
    %33 = vector.load %arg12[%c2_21, %c0_22, %c0_23] : memref<8x8x128xf32, #tpu.memory_space<vmem>>, vector<1x8x128xf32>
    %34 = vector.shape_cast %33 : vector<1x8x128xf32> to vector<8x128xf32>
    %35 = vector.shape_cast %32 : vector<8x128xf32> to vector<1x8x128xf32>
    tpu.vector_store %arg12[%c2_21, %c0_22, %c0_23], %35 {strides = array<i32>} : memref<8x8x128xf32, #tpu.memory_space<vmem>>, vector<1x8x128xf32>,
    %c3 = arith.constant 3 : index
    %c0_24 = arith.constant 0 : index
    %c0_25 = arith.constant 0 : index
    %36 = vector.load %arg2[%c3, %c0_24, %c0_25] : memref<8x8x128xbf16, #tpu.memory_space<vmem>>, vector<1x8x128xbf16>
    %37 = vector.shape_cast %36 : vector<1x8x128xbf16> to vector<8x128xbf16>
    %38 = arith.extf %37 : vector<8x128xbf16> to vector<8x128xf32>
    %39 = arith.truncf %32 : vector<8x128xf32> to vector<8x128xbf16>
    %cst_26 = arith.constant dense<0.000000e+00> : vector<8x128xf32>
    %40 = tpu.matmul %39, %3, %cst_26 {dimension_numbers = #tpu.dot_dimension_numbers<[1], [0], [0], [1], [0, 0, 1, 1], [], []>} : vector<8x128xbf16>, vector<128x128xbf16>, vector<8x128xf32> -> vector<8x128xf32>
    %41 = arith.addf %38, %40 : vector<8x128xf32>
    %42 = math.tanh %41 : vector<8x128xf32>
    %c3_27 = arith.constant 3 : index
    %c0_28 = arith.constant 0 : index
    %c0_29 = arith.constant 0 : index
    %43 = vector.load %arg12[%c3_27, %c0_28, %c0_29] : memref<8x8x128xf32, #tpu.memory_space<vmem>>, vector<1x8x128xf32>
    %44 = vector.shape_cast %43 : vector<1x8x128xf32> to vector<8x128xf32>
    %45 = vector.shape_cast %42 : vector<8x128xf32> to vector<1x8x128xf32>
    tpu.vector_store %arg12[%c3_27, %c0_28, %c0_29], %45 {strides = array<i32>} : memref<8x8x128xf32, #tpu.memory_space<vmem>>, vector<1x8x128xf32>,
    %c4 = arith.constant 4 : index
    %c0_30 = arith.constant 0 : index
    %c0_31 = arith.constant 0 : index
    %46 = vector.load %arg2[%c4, %c0_30, %c0_31] : memref<8x8x128xbf16, #tpu.memory_space<vmem>>, vector<1x8x128xbf16>
    %47 = vector.shape_cast %46 : vector<1x8x128xbf16> to vector<8x128xbf16>
    %48 = arith.extf %47 : vector<8x128xbf16> to vector<8x128xf32>
    %49 = arith.truncf %42 : vector<8x128xf32> to vector<8x128xbf16>
    %cst_32 = arith.constant dense<0.000000e+00> : vector<8x128xf32>
    %50 = tpu.matmul %49, %3, %cst_32 {dimension_numbers = #tpu.dot_dimension_numbers<[1], [0], [0], [1], [0, 0, 1, 1], [], []>} : vector<8x128xbf16>, vector<128x128xbf16>, vector<8x128xf32> -> vector<8x128xf32>
    %51 = arith.addf %48, %50 : vector<8x128xf32>
    %52 = math.tanh %51 : vector<8x128xf32>
    %c4_33 = arith.constant 4 : index
    %c0_34 = arith.constant 0 : index
    %c0_35 = arith.constant 0 : index
    %53 = vector.load %arg12[%c4_33, %c0_34, %c0_35] : memref<8x8x128xf32, #tpu.memory_space<vmem>>, vector<1x8x128xf32>
    %54 = vector.shape_cast %53 : vector<1x8x128xf32> to vector<8x128xf32>
    %55 = vector.shape_cast %52 : vector<8x128xf32> to vector<1x8x128xf32>
    tpu.vector_store %arg12[%c4_33, %c0_34, %c0_35], %55 {strides = array<i32>} : memref<8x8x128xf32, #tpu.memory_space<vmem>>, vector<1x8x128xf32>,
    %c5 = arith.constant 5 : index
    %c0_36 = arith.constant 0 : index
    %c0_37 = arith.constant 0 : index
    %56 = vector.load %arg2[%c5, %c0_36, %c0_37] : memref<8x8x128xbf16, #tpu.memory_space<vmem>>, vector<1x8x128xbf16>
    %57 = vector.shape_cast %56 : vector<1x8x128xbf16> to vector<8x128xbf16>
    %58 = arith.extf %57 : vector<8x128xbf16> to vector<8x128xf32>
    %59 = arith.truncf %52 : vector<8x128xf32> to vector<8x128xbf16>
    %cst_38 = arith.constant dense<0.000000e+00> : vector<8x128xf32>
    %60 = tpu.matmul %59, %3, %cst_38 {dimension_numbers = #tpu.dot_dimension_numbers<[1], [0], [0], [1], [0, 0, 1, 1], [], []>} : vector<8x128xbf16>, vector<128x128xbf16>, vector<8x128xf32> -> vector<8x128xf32>
    %61 = arith.addf %58, %60 : vector<8x128xf32>
    %62 = math.tanh %61 : vector<8x128xf32>
    %c5_39 = arith.constant 5 : index
    %c0_40 = arith.constant 0 : index
    %c0_41 = arith.constant 0 : index
    %63 = vector.load %arg12[%c5_39, %c0_40, %c0_41] : memref<8x8x128xf32, #tpu.memory_space<vmem>>, vector<1x8x128xf32>
    %64 = vector.shape_cast %63 : vector<1x8x128xf32> to vector<8x128xf32>
    %65 = vector.shape_cast %62 : vector<8x128xf32> to vector<1x8x128xf32>
    tpu.vector_store %arg12[%c5_39, %c0_40, %c0_41], %65 {strides = array<i32>} : memref<8x8x128xf32, #tpu.memory_space<vmem>>, vector<1x8x128xf32>,
    %c6 = arith.constant 6 : index
    %c0_42 = arith.constant 0 : index
    %c0_43 = arith.constant 0 : index
    %66 = vector.load %arg2[%c6, %c0_42, %c0_43] : memref<8x8x128xbf16, #tpu.memory_space<vmem>>, vector<1x8x128xbf16>
    %67 = vector.shape_cast %66 : vector<1x8x128xbf16> to vector<8x128xbf16>
    %68 = arith.extf %67 : vector<8x128xbf16> to vector<8x128xf32>
    %69 = arith.truncf %62 : vector<8x128xf32> to vector<8x128xbf16>
    %cst_44 = arith.constant dense<0.000000e+00> : vector<8x128xf32>
    %70 = tpu.matmul %69, %3, %cst_44 {dimension_numbers = #tpu.dot_dimension_numbers<[1], [0], [0], [1], [0, 0, 1, 1], [], []>} : vector<8x128xbf16>, vector<128x128xbf16>, vector<8x128xf32> -> vector<8x128xf32>
    %71 = arith.addf %68, %70 : vector<8x128xf32>
    %72 = math.tanh %71 : vector<8x128xf32>
    %c6_45 = arith.constant 6 : index
    %c0_46 = arith.constant 0 : index
    %c0_47 = arith.constant 0 : index
    %73 = vector.load %arg12[%c6_45, %c0_46, %c0_47] : memref<8x8x128xf32, #tpu.memory_space<vmem>>, vector<1x8x128xf32>
    %74 = vector.shape_cast %73 : vector<1x8x128xf32> to vector<8x128xf32>
    %75 = vector.shape_cast %72 : vector<8x128xf32> to vector<1x8x128xf32>
    tpu.vector_store %arg12[%c6_45, %c0_46, %c0_47], %75 {strides = array<i32>} : memref<8x8x128xf32, #tpu.memory_space<vmem>>, vector<1x8x128xf32>,
    %c7 = arith.constant 7 : index
    %c0_48 = arith.constant 0 : index
    %c0_49 = arith.constant 0 : index
    %76 = vector.load %arg2[%c7, %c0_48, %c0_49] : memref<8x8x128xbf16, #tpu.memory_space<vmem>>, vector<1x8x128xbf16>
    %77 = vector.shape_cast %76 : vector<1x8x128xbf16> to vector<8x128xbf16>
    %78 = arith.extf %77 : vector<8x128xbf16> to vector<8x128xf32>
    %79 = arith.truncf %72 : vector<8x128xf32> to vector<8x128xbf16>
    %cst_50 = arith.constant dense<0.000000e+00> : vector<8x128xf32>
    %80 = tpu.matmul %79, %3, %cst_50 {dimension_numbers = #tpu.dot_dimension_numbers<[1], [0], [0], [1], [0, 0, 1, 1], [], []>} : vector<8x128xbf16>, vector<128x128xbf16>, vector<8x128xf32> -> vector<8x128xf32>
    %81 = arith.addf %78, %80 : vector<8x128xf32>
    %82 = math.tanh %81 : vector<8x128xf32>
    %c7_51 = arith.constant 7 : index
    %c0_52 = arith.constant 0 : index
    %c0_53 = arith.constant 0 : index
    %83 = vector.load %arg12[%c7_51, %c0_52, %c0_53] : memref<8x8x128xf32, #tpu.memory_space<vmem>>, vector<1x8x128xf32>
    %84 = vector.shape_cast %83 : vector<1x8x128xf32> to vector<8x128xf32>
    %85 = vector.shape_cast %82 : vector<8x128xf32> to vector<1x8x128xf32>
    tpu.vector_store %arg12[%c7_51, %c0_52, %c0_53], %85 {strides = array<i32>} : memref<8x8x128xf32, #tpu.memory_space<vmem>>, vector<1x8x128xf32>,
    %c0_54 = arith.constant 0 : index
    %c0_55 = arith.constant 0 : index
    %86 = vector.load %arg10[%c0_54, %c0_55] : memref<8x128xf32, #tpu.memory_space<vmem>>, vector<8x128xf32>
    tpu.vector_store %arg10[%c0_54, %c0_55], %82 {strides = array<i32>} : memref<8x128xf32, #tpu.memory_space<vmem>>, vector<8x128xf32>,
    %c0_56 = arith.constant 0 : index
    %c0_57 = arith.constant 0 : index
    %c0_58 = arith.constant 0 : index
    %87 = vector.load %arg12[%c0_56, %c0_57, %c0_58] : memref<8x8x128xf32, #tpu.memory_space<vmem>>, vector<8x8x128xf32>
    %88 = vector.shape_cast %87 : vector<8x8x128xf32> to vector<64x128xf32>
    %89 = arith.truncf %88 : vector<64x128xf32> to vector<64x128xbf16>
    %c0_59 = arith.constant 0 : index
    %c0_60 = arith.constant 0 : index
    %90 = vector.load %arg4[%c0_59, %c0_60] : memref<128x128xbf16, #tpu.memory_space<vmem>>, vector<128x128xbf16>
    %cst_61 = arith.constant dense<0.000000e+00> : vector<64x128xf32>
    %91 = tpu.matmul %89, %90, %cst_61 {dimension_numbers = #tpu.dot_dimension_numbers<[1], [0], [0], [1], [0, 0, 1, 1], [], []>} : vector<64x128xbf16>, vector<128x128xbf16>, vector<64x128xf32> -> vector<64x128xf32>
    %c0_62 = arith.constant 0 : index
    %c0_63 = arith.constant 0 : index
    %92 = vector.load %arg6[%c0_62, %c0_63] : memref<1x128xf32, #tpu.memory_space<vmem>>, vector<1x128xf32>
    %93 = vector.broadcast %92 : vector<1x128xf32> to vector<64x128xf32>
    %94 = arith.addf %91, %93 : vector<64x128xf32>
    %95 = vector.shape_cast %94 : vector<64x128xf32> to vector<8x8x128xf32>
    %c0_64 = arith.constant 0 : index
    %c0_65 = arith.constant 0 : index
    %c0_66 = arith.constant 0 : index
    %96 = vector.load %arg12[%c0_64, %c0_65, %c0_66] : memref<8x8x128xf32, #tpu.memory_space<vmem>>, vector<8x8x128xf32>
    tpu.vector_store %arg12[%c0_64, %c0_65, %c0_66], %95 {strides = array<i32>} : memref<8x8x128xf32, #tpu.memory_space<vmem>>, vector<8x8x128xf32>,
    %c0_67 = arith.constant 0 : index
    %c0_68 = arith.constant 0 : index
    %97 = vector.load %arg11[%c0_67, %c0_68] : memref<8x128xf32, #tpu.memory_space<vmem>>, vector<8x128xf32>
    %c0_69 = arith.constant 0 : index
    %c0_70 = arith.constant 0 : index
    %c0_71 = arith.constant 0 : index
    %98 = vector.load %arg12[%c0_69, %c0_70, %c0_71] : memref<8x8x128xf32, #tpu.memory_space<vmem>>, vector<1x8x128xf32>
    %99 = vector.shape_cast %98 : vector<1x8x128xf32> to vector<8x128xf32>
    %100 = arith.truncf %97 : vector<8x128xf32> to vector<8x128xbf16>
    %cst_72 = arith.constant dense<0.000000e+00> : vector<8x128xf32>
    %101 = tpu.matmul %100, %4, %cst_72 {dimension_numbers = #tpu.dot_dimension_numbers<[1], [0], [0], [1], [0, 0, 1, 1], [], []>} : vector<8x128xbf16>, vector<128x128xbf16>, vector<8x128xf32> -> vector<8x128xf32>
    %102 = arith.addf %99, %101 : vector<8x128xf32>
    %103 = math.tanh %102 : vector<8x128xf32>
    %c1_73 = arith.constant 1 : index
    %c0_74 = arith.constant 0 : index
    %c0_75 = arith.constant 0 : index
    %104 = vector.load %arg12[%c1_73, %c0_74, %c0_75] : memref<8x8x128xf32, #tpu.memory_space<vmem>>, vector<1x8x128xf32>
    %105 = vector.shape_cast %104 : vector<1x8x128xf32> to vector<8x128xf32>
    %106 = arith.truncf %103 : vector<8x128xf32> to vector<8x128xbf16>
    %cst_76 = arith.constant dense<0.000000e+00> : vector<8x128xf32>
    %107 = tpu.matmul %106, %4, %cst_76 {dimension_numbers = #tpu.dot_dimension_numbers<[1], [0], [0], [1], [0, 0, 1, 1], [], []>} : vector<8x128xbf16>, vector<128x128xbf16>, vector<8x128xf32> -> vector<8x128xf32>
    %108 = arith.addf %105, %107 : vector<8x128xf32>
    %109 = math.tanh %108 : vector<8x128xf32>
    %c2_77 = arith.constant 2 : index
    %c0_78 = arith.constant 0 : index
    %c0_79 = arith.constant 0 : index
    %110 = vector.load %arg12[%c2_77, %c0_78, %c0_79] : memref<8x8x128xf32, #tpu.memory_space<vmem>>, vector<1x8x128xf32>
    %111 = vector.shape_cast %110 : vector<1x8x128xf32> to vector<8x128xf32>
    %112 = arith.truncf %109 : vector<8x128xf32> to vector<8x128xbf16>
    %cst_80 = arith.constant dense<0.000000e+00> : vector<8x128xf32>
    %113 = tpu.matmul %112, %4, %cst_80 {dimension_numbers = #tpu.dot_dimension_numbers<[1], [0], [0], [1], [0, 0, 1, 1], [], []>} : vector<8x128xbf16>, vector<128x128xbf16>, vector<8x128xf32> -> vector<8x128xf32>
    %114 = arith.addf %111, %113 : vector<8x128xf32>
    %115 = math.tanh %114 : vector<8x128xf32>
    %c3_81 = arith.constant 3 : index
    %c0_82 = arith.constant 0 : index
    %c0_83 = arith.constant 0 : index
    %116 = vector.load %arg12[%c3_81, %c0_82, %c0_83] : memref<8x8x128xf32, #tpu.memory_space<vmem>>, vector<1x8x128xf32>
    %117 = vector.shape_cast %116 : vector<1x8x128xf32> to vector<8x128xf32>
    %118 = arith.truncf %115 : vector<8x128xf32> to vector<8x128xbf16>
    %cst_84 = arith.constant dense<0.000000e+00> : vector<8x128xf32>
    %119 = tpu.matmul %118, %4, %cst_84 {dimension_numbers = #tpu.dot_dimension_numbers<[1], [0], [0], [1], [0, 0, 1, 1], [], []>} : vector<8x128xbf16>, vector<128x128xbf16>, vector<8x128xf32> -> vector<8x128xf32>
    %120 = arith.addf %117, %119 : vector<8x128xf32>
    %121 = math.tanh %120 : vector<8x128xf32>
    %c4_85 = arith.constant 4 : index
    %c0_86 = arith.constant 0 : index
    %c0_87 = arith.constant 0 : index
    %122 = vector.load %arg12[%c4_85, %c0_86, %c0_87] : memref<8x8x128xf32, #tpu.memory_space<vmem>>, vector<1x8x128xf32>
    %123 = vector.shape_cast %122 : vector<1x8x128xf32> to vector<8x128xf32>
    %124 = arith.truncf %121 : vector<8x128xf32> to vector<8x128xbf16>
    %cst_88 = arith.constant dense<0.000000e+00> : vector<8x128xf32>
    %125 = tpu.matmul %124, %4, %cst_88 {dimension_numbers = #tpu.dot_dimension_numbers<[1], [0], [0], [1], [0, 0, 1, 1], [], []>} : vector<8x128xbf16>, vector<128x128xbf16>, vector<8x128xf32> -> vector<8x128xf32>
    %126 = arith.addf %123, %125 : vector<8x128xf32>
    %127 = math.tanh %126 : vector<8x128xf32>
    %c5_89 = arith.constant 5 : index
    %c0_90 = arith.constant 0 : index
    %c0_91 = arith.constant 0 : index
    %128 = vector.load %arg12[%c5_89, %c0_90, %c0_91] : memref<8x8x128xf32, #tpu.memory_space<vmem>>, vector<1x8x128xf32>
    %129 = vector.shape_cast %128 : vector<1x8x128xf32> to vector<8x128xf32>
    %130 = arith.truncf %127 : vector<8x128xf32> to vector<8x128xbf16>
    %cst_92 = arith.constant dense<0.000000e+00> : vector<8x128xf32>
    %131 = tpu.matmul %130, %4, %cst_92 {dimension_numbers = #tpu.dot_dimension_numbers<[1], [0], [0], [1], [0, 0, 1, 1], [], []>} : vector<8x128xbf16>, vector<128x128xbf16>, vector<8x128xf32> -> vector<8x128xf32>
    %132 = arith.addf %129, %131 : vector<8x128xf32>
    %133 = math.tanh %132 : vector<8x128xf32>
    %c6_93 = arith.constant 6 : index
    %c0_94 = arith.constant 0 : index
    %c0_95 = arith.constant 0 : index
    %134 = vector.load %arg12[%c6_93, %c0_94, %c0_95] : memref<8x8x128xf32, #tpu.memory_space<vmem>>, vector<1x8x128xf32>
    %135 = vector.shape_cast %134 : vector<1x8x128xf32> to vector<8x128xf32>
    %136 = arith.truncf %133 : vector<8x128xf32> to vector<8x128xbf16>
    %cst_96 = arith.constant dense<0.000000e+00> : vector<8x128xf32>
    %137 = tpu.matmul %136, %4, %cst_96 {dimension_numbers = #tpu.dot_dimension_numbers<[1], [0], [0], [1], [0, 0, 1, 1], [], []>} : vector<8x128xbf16>, vector<128x128xbf16>, vector<8x128xf32> -> vector<8x128xf32>
    %138 = arith.addf %135, %137 : vector<8x128xf32>
    %139 = math.tanh %138 : vector<8x128xf32>
    %c7_97 = arith.constant 7 : index
    %c0_98 = arith.constant 0 : index
    %c0_99 = arith.constant 0 : index
    %140 = vector.load %arg12[%c7_97, %c0_98, %c0_99] : memref<8x8x128xf32, #tpu.memory_space<vmem>>, vector<1x8x128xf32>
    %141 = vector.shape_cast %140 : vector<1x8x128xf32> to vector<8x128xf32>
    %142 = arith.truncf %139 : vector<8x128xf32> to vector<8x128xbf16>
    %cst_100 = arith.constant dense<0.000000e+00> : vector<8x128xf32>
    %143 = tpu.matmul %142, %4, %cst_100 {dimension_numbers = #tpu.dot_dimension_numbers<[1], [0], [0], [1], [0, 0, 1, 1], [], []>} : vector<8x128xbf16>, vector<128x128xbf16>, vector<8x128xf32> -> vector<8x128xf32>
    %144 = arith.addf %141, %143 : vector<8x128xf32>
    %145 = math.tanh %144 : vector<8x128xf32>
    %c0_101 = arith.constant 0 : index
    %c0_102 = arith.constant 0 : index
    %146 = vector.load %arg11[%c0_101, %c0_102] : memref<8x128xf32, #tpu.memory_space<vmem>>, vector<8x128xf32>
    tpu.vector_store %arg11[%c0_101, %c0_102], %145 {strides = array<i32>} : memref<8x128xf32, #tpu.memory_space<vmem>>, vector<8x128xf32>,
    %c0_i32_103 = arith.constant 0 : i32
    %147 = arith.cmpi eq, %arg1, %c0_i32_103 : i32
    %148 = arith.extui %147 : i1 to i32
    %c0_i32_104 = arith.constant 0 : i32
    %149 = arith.cmpi ne, %148, %c0_i32_104 : i32
    scf.if %149 {
      %c0_105 = arith.constant 0 : index
      %c0_106 = arith.constant 0 : index
      %150 = vector.load %arg7[%c0_105, %c0_106] : memref<128x5xf32, #tpu.memory_space<vmem>>, vector<128x5xf32>
      %cst_107 = arith.constant dense<0.000000e+00> : vector<8x5xf32>
      %151 = tpu.matmul %145, %150, %cst_107 {dimension_numbers = #tpu.dot_dimension_numbers<[1], [0], [0], [1], [0, 0, 1, 1], [], []>} : vector<8x128xf32>, vector<128x5xf32>, vector<8x5xf32> -> vector<8x5xf32>
      %c0_108 = arith.constant 0 : index
      %c0_109 = arith.constant 0 : index
      %152 = vector.load %arg8[%c0_108, %c0_109] : memref<1x5xf32, #tpu.memory_space<vmem>>, vector<1x5xf32>
      %153 = vector.broadcast %152 : vector<1x5xf32> to vector<8x5xf32>
      %154 = arith.addf %151, %153 : vector<8x5xf32>
      %cst_110 = arith.constant dense<0xFF800000> : vector<8xf32>
      %155 = vector.multi_reduction <maximumf>, %154, %cst_110 [1] : vector<8x5xf32> to vector<8xf32>
      %156 = vector.shape_cast %155 : vector<8xf32> to vector<8x1xf32>
      %157 = vector.broadcast %156 : vector<8x1xf32> to vector<8x5xf32>
      %158 = arith.subf %154, %157 : vector<8x5xf32>
      %159 = math.exp %158 : vector<8x5xf32>
      %cst_111 = arith.constant dense<0.000000e+00> : vector<8xf32>
      %160 = vector.multi_reduction <add>, %159, %cst_111 [1] : vector<8x5xf32> to vector<8xf32>
      %161 = vector.shape_cast %160 : vector<8xf32> to vector<8x1xf32>
      %162 = vector.broadcast %161 : vector<8x1xf32> to vector<8x5xf32>
      %163 = arith.divf %159, %162 : vector<8x5xf32>
      %c0_112 = arith.constant 0 : index
      %c0_113 = arith.constant 0 : index
      %164 = vector.load %arg9[%c0_112, %c0_113] : memref<8x5xf32, #tpu.memory_space<vmem>>, vector<8x5xf32>
      tpu.vector_store %arg9[%c0_112, %c0_113], %163 {strides = array<i32>} : memref<8x5xf32, #tpu.memory_space<vmem>>, vector<8x5xf32>,
    } else {
    }
    return
  }
  func.func @transform_0(%arg0: i32, %arg1: i32) -> (i32, i32, i32) {
    %c0_i32 = arith.constant 0 : i32
    %c0_i32_0 = arith.constant 0 : i32
    return %arg1, %arg0, %c0_i32 : i32, i32, i32
  }
  func.func @transform_1(%arg0: i32, %arg1: i32) -> (i32, i32) {
    %c0_i32 = arith.constant 0 : i32
    %c0_i32_0 = arith.constant 0 : i32
    %c0_i32_1 = arith.constant 0 : i32
    return %c0_i32, %c0_i32_0 : i32, i32
  }
  func.func @transform_2(%arg0: i32, %arg1: i32) -> (i32, i32) {
    %c0_i32 = arith.constant 0 : i32
    %c0_i32_0 = arith.constant 0 : i32
    %c0_i32_1 = arith.constant 0 : i32
    return %c0_i32, %c0_i32_0 : i32, i32
  }
  func.func @transform_3(%arg0: i32, %arg1: i32) -> (i32, i32) {
    %c0_i32 = arith.constant 0 : i32
    %c0_i32_0 = arith.constant 0 : i32
    %c0_i32_1 = arith.constant 0 : i32
    return %c0_i32, %c0_i32_0 : i32, i32
  }
  func.func @transform_4(%arg0: i32, %arg1: i32) -> (i32, i32) {
    %c0_i32 = arith.constant 0 : i32
    %c0_i32_0 = arith.constant 0 : i32
    %c0_i32_1 = arith.constant 0 : i32
    return %c0_i32, %c0_i32_0 : i32, i32
  }
  func.func @transform_5(%arg0: i32, %arg1: i32) -> (i32, i32) {
    %c0_i32 = arith.constant 0 : i32
    %c0_i32_0 = arith.constant 0 : i32
    %c0_i32_1 = arith.constant 0 : i32
    return %c0_i32, %c0_i32_0 : i32, i32
  }
  func.func @transform_6(%arg0: i32, %arg1: i32) -> (i32, i32) {
    %c0_i32 = arith.constant 0 : i32
    %c0_i32_0 = arith.constant 0 : i32
    %c0_i32_1 = arith.constant 0 : i32
    return %c0_i32, %c0_i32_0 : i32, i32
  }
  func.func @transform_7(%arg0: i32, %arg1: i32) -> (i32, i32) {
    %c0_i32 = arith.constant 0 : i32
    %c0_i32_0 = arith.constant 0 : i32
    return %arg0, %c0_i32 : i32, i32
  }
}

</mosaic_0001>

<bundles_post_ra>
// kernel: method_rnn_forward.3
= control target key start
LH: loop header
LB: loop body
LE: loop exit
PB: predicated region body
PF: predicated region fallthrough
CT: control target
= control target key end

     0   :  { %v1850_v1 = vmov 0.0   ;;  %vm1851_vm0 = vmmov 0   ;;  %s2423_s0 = inlined_call_operand.vmem [shape: bf16[8,8,128], index: 0, kind: input, shape index: {}]   ;;  %s2424_s1 = inlined_call_operand.vmem [shape: bf16[128,128], index: 1, kind: input, shape index: {}]   ;;  %s2425_s2 = inlined_call_operand.vmem [shape: bf16[128,128], index: 2, kind: input, shape index: {}]   ;;  %s2426_s3 = inlined_call_operand.vmem [shape: bf16[128,128], index: 3, kind: input, shape index: {}]   ;;  %s2427_s4 = inlined_call_operand.vmem [shape: f32[1,128], index: 4, kind: input, shape index: {}]   ;;  %s2428_s5 = inlined_call_operand.vmem [shape: f32[128,5], index: 5, kind: input, shape index: {}]   ;;  %s2429_s6 = inlined_call_operand.vmem [shape: f32[1,5], index: 6, kind: input, shape index: {}]   ;;  %s2430_s7 = inlined_call_operand.hbm [shape: f32[8,5], index: 7, kind: output, shape index: {}]  }
   0x1   :  { %v1897_v0 = vld [vmem:[%s2424_s1 + $0x38] sm:$0xff]   ;;  %1385 = vmatprep.subr.bf16.mxu0 %v1850_v1  ;;  %1405 = vmatprep.subr.bf16.mxu1 %v1850_v1  ;;  %v1905_v2 = vld [vmem:[%s2424_s1 + $0x30] sm:$0xff]   ;;  %v1918_v3 = vld [vmem:[%s2424_s1 + $0x28] sm:$0xff]  }
   0x2   :  { %1386 = vmatpush3.bf16.msra.mxu0 %v1897_v0  ;;  %1401 = vmatprep.mubr.msk.bf16.mxu0 %vm1851_vm0, %v1850_v1  ;;  %v1925_v4 = vld [vmem:[%s2424_s1 + $0x20] sm:$0xff]   ;;  %v1934_v5 = vld [vmem:[%s2424_s1 + $0x18] sm:$0xff]   ;;  %v1943_v6 = vld [vmem:[%s2424_s1 + $0x10] sm:$0xff]  }
   0x3   :  { %1387 = vmatprep.subr.bf16.mxu0 %v1850_v1  ;;  %1406 = vmatpush3.bf16.msra.mxu1 %v1897_v0 }
   0x4   :  { %1407 = vmatprep.subr.bf16.mxu1 %v1850_v1  ;;  %1421 = vmatprep.mubr.msk.bf16.mxu1 %vm1851_vm0, %v1850_v1 }
   0x6   :  { %1388 = vmatpush3.bf16.msra.mxu0 %v1905_v2 }
   0x7   :  { %1389 = vmatprep.subr.bf16.mxu0 %v1850_v1  ;;  %1408 = vmatpush3.bf16.msra.mxu1 %v1905_v2 }
   0x8   :  { %1409 = vmatprep.subr.bf16.mxu1 %v1850_v1 }
   0xa   :  { %1390 = vmatpush3.bf16.msra.mxu0 %v1918_v3 }
   0xb   :  { %1391 = vmatprep.subr.bf16.mxu0 %v1850_v1  ;;  %1410 = vmatpush3.bf16.msra.mxu1 %v1918_v3 }
   0xc   :  { %1411 = vmatprep.subr.bf16.mxu1 %v1850_v1 }
   0xe   :  { %1392 = vmatpush3.bf16.msra.mxu0 %v1925_v4 }
   0xf   :  { %1393 = vmatprep.subr.bf16.mxu0 %v1850_v1  ;;  %1412 = vmatpush3.bf16.msra.mxu1 %v1925_v4 }
  0x10   :  { %1413 = vmatprep.subr.bf16.mxu1 %v1850_v1 }
  0x12   :  { %1394 = vmatpush3.bf16.msra.mxu0 %v1934_v5 }
  0x13   :  { %1395 = vmatprep.subr.bf16.mxu0 %v1850_v1  ;;  %1414 = vmatpush3.bf16.msra.mxu1 %v1934_v5 }
  0x14   :  { %12 = vsyncpa [#allocation6], 0  ;;  %1415 = vmatprep.subr.bf16.mxu1 %v1850_v1  ;;  %v1954_v7 = vld [vmem:[%s2424_s1 + $0x8] sm:$0xff]   ;;  %v1963_v8 = vld [vmem:[%s2424_s1] sm:$0xff]   ;;  %v1852_v9 = vmov 0.0|0.0   ;;  %vm1152_vm1 = vcmask 39936  }
  0x15   :  { %v67_v10 = vld [vmem:[%s2423_s0] sm:$0xff]   ;;  %v1188_v27 = vld [vmem:[%s2423_s0 + $0x8] sm:$0xff]   ;;  %v1190_v44 = vld [vmem:[%s2423_s0 + $0x10] sm:$0xff]  }
  0x16   :  { %1396 = vmatpush3.bf16.msra.mxu0 %v1943_v6  ;;  %v68_v11 = vunpack.c.l.bf16 %v67_v10  ;;  %v163_v19 = vunpack.c.h.bf16 %v67_v10  ;;  %v211_v28 = vunpack.c.l.bf16 %v1188_v27  ;;  %v259_v36 = vunpack.c.h.bf16 %v1188_v27  ;;  %v1776_v53 = vld [vmem:[%s2425_s2 + $0x38] sm:$0xff]   ;;  %v1777_v62 = vld [vmem:[%s2425_s2 + $0x30] sm:$0xff]  }
  0x17   :  { %1397 = vmatprep.subr.bf16.mxu0 %v1850_v1  ;;  %1416 = vmatpush3.bf16.msra.mxu1 %v1943_v6  ;;  %v307_v45 = vunpack.c.l.bf16 %v1190_v44  ;;  %v355_v54 = vunpack.c.h.bf16 %v1190_v44  ;;  %v2137_v10 = vld [vmem:[%s2426_s3 + $0x38] sm:$0xff]  }
  0x18   :  { %1417 = vmatprep.subr.bf16.mxu1 %v1850_v1 }
  0x1a   :  { %1398 = vmatpush3.bf16.msra.mxu0 %v1954_v7 }
  0x1b   :  { %1399 = vmatprep.subr.bf16.mxu0 %v1850_v1  ;;  %1418 = vmatpush3.bf16.msra.mxu1 %v1954_v7 }
  0x1c   :  { %1419 = vmatprep.subr.bf16.mxu1 %v1850_v1 }
  0x1e   :  { %1400 = vmatpush3.bf16.msra.mxu0 %v1963_v8 }
  0x1f   :  { %1420 = vmatpush3.bf16.msra.mxu1 %v1963_v8  ;;  %1425 = vmatprep.subr.bf16.mxu0 %v1850_v1 }
  0x20   :  { %1445 = vmatprep.subr.bf16.mxu1 %v1850_v1 }
  0x21   :  { %1402 = vmatmul.mubr.bf16.vlgmr.msra.gmra.mxu0 %v1852_v9 }
  0x22   :  { %1426 = vmatpush3.bf16.msra.mxu0 %v1897_v0  ;;  %1441 = vmatprep.mubr.msk.bf16.mxu0 %vm1851_vm0, %v1850_v1 }
  0x23   :  { %1427 = vmatprep.subr.bf16.mxu0 %v1850_v1 }
  0x26   :  { %1428 = vmatpush3.bf16.msra.mxu0 %v1905_v2 }
  0x27   :  { %1429 = vmatprep.subr.bf16.mxu0 %v1850_v1 }
  0x2a   :  { %1430 = vmatpush3.bf16.msra.mxu0 %v1918_v3 }
  0x2b   :  { %1431 = vmatprep.subr.bf16.mxu0 %v1850_v1 }
  0x2e   :  { %1432 = vmatpush3.bf16.msra.mxu0 %v1925_v4 }
  0x2f   :  { %1433 = vmatprep.subr.bf16.mxu0 %v1850_v1 }
  0x32   :  { %1434 = vmatpush3.bf16.msra.mxu0 %v1934_v5 }
  0x33   :  { %1435 = vmatprep.subr.bf16.mxu0 %v1850_v1 }
  0x36   :  { %1436 = vmatpush3.bf16.msra.mxu0 %v1943_v6 }
  0x37   :  { %1437 = vmatprep.subr.bf16.mxu0 %v1850_v1 }
  0x3a   :  { %1438 = vmatpush3.bf16.msra.mxu0 %v1954_v7 }
  0x3b   :  { %1439 = vmatprep.subr.bf16.mxu0 %v1850_v1 }
  0x3e   :  { %1440 = vmatpush3.bf16.msra.mxu0 %v1963_v8 }
  0x3f   :  { %1465 = vmatprep.subr.bf16.mxu0 %v1850_v1 }
  0xe1   :  { %v152_v12 = vpop.f32.mrf.mxu0 }
  0xe2   :  { %v158_v13 = vadd.f32 %v152_v12, %v68_v11  ;;  %v2144_v11 = vld [vmem:[%s2426_s3 + $0x30] sm:$0xff]   ;;  %v2151_v12 = vld [vmem:[%s2426_s3 + $0x28] sm:$0xff]  }
  0xe3   :  { %v1403_v14 = vpop.f32.mrf.mxu0 }
  0xe4   :  { %1792 = vtanh.f32 %v158_v13  ;;  %v2158_v13 = vld [vmem:[%s2426_s3 + $0x20] sm:$0xff]   ;;  %v2165_v14 = vld [vmem:[%s2426_s3 + $0x18] sm:$0xff]  }
  0xe5   :  { %v155_v15 = vpop.f32.mrf.mxu0 }
  0xe6   :  { %v2172_v15 = vld [vmem:[%s2426_s3 + $0x10] sm:$0xff]  }
  0xe7   :  { %v1404_v16 = vpop.f32.mrf.mxu0 }
  0xe8   :  { %v2179_v16 = vld [vmem:[%s2426_s3 + $0x8] sm:$0xff]  }
  0xf1   :  { %v1994_v17 = vpop.eup %1792 }
  0xf2   :  { %v164_v18 = vpack.c.bf16 %v1994_v17, %v1994_v17 }
  0xf4   :  { %1422 = vmatmul.mubr.bf16.vlgmr.msra.gmra.mxu1 %v164_v18  ;;  %v1192_v18 = vld [vmem:[%s2423_s0 + $0x18] sm:$0xff]  }
  0xf5   :  { %1446 = vmatpush3.bf16.msra.mxu1 %v1897_v0  ;;  %1461 = vmatprep.mubr.msk.bf16.mxu1 %vm1851_vm0, %v1850_v1 }
  0xf6   :  { %1447 = vmatprep.subr.bf16.mxu1 %v1850_v1 }
  0xf9   :  { %1448 = vmatpush3.bf16.msra.mxu1 %v1905_v2 }
  0xfa   :  { %1449 = vmatprep.subr.bf16.mxu1 %v1850_v1 }
  0xfd   :  { %1450 = vmatpush3.bf16.msra.mxu1 %v1918_v3 }
  0xfe   :  { %1451 = vmatprep.subr.bf16.mxu1 %v1850_v1 }
 0x101   :  { %1452 = vmatpush3.bf16.msra.mxu1 %v1925_v4 }
 0x102   :  { %1453 = vmatprep.subr.bf16.mxu1 %v1850_v1 }
 0x105   :  { %1454 = vmatpush3.bf16.msra.mxu1 %v1934_v5 }
 0x106   :  { %1455 = vmatprep.subr.bf16.mxu1 %v1850_v1 }
 0x109   :  { %1456 = vmatpush3.bf16.msra.mxu1 %v1943_v6 }
 0x10a   :  { %1457 = vmatprep.subr.bf16.mxu1 %v1850_v1 }
 0x10d   :  { %1458 = vmatpush3.bf16.msra.mxu1 %v1954_v7 }
 0x10e   :  { %1459 = vmatprep.subr.bf16.mxu1 %v1850_v1 }
 0x111   :  { %1460 = vmatpush3.bf16.msra.mxu1 %v1963_v8 }
 0x112   :  { %1485 = vmatprep.subr.bf16.mxu1 %v1850_v1 }
 0x1b4   :  { %v199_v20 = vpop.f32.mrf.mxu1 }
 0x1b5   :  { %v205_v21 = vadd.f32 %v199_v20, %v163_v19  ;;  %v403_v19 = vunpack.c.l.bf16 %v1192_v18 }
 0x1b6   :  { %v1423_v22 = vpop.f32.mrf.mxu1 }
 0x1b7   :  { %1794 = vtanh.f32 %v205_v21 }
 0x1b8   :  { %v202_v23 = vpop.f32.mrf.mxu1 }
 0x1ba   :  { %v1424_v24 = vpop.f32.mrf.mxu1 }
 0x1c4   :  { %v2016_v25 = vpop.eup %1794 }
 0x1c5   :  { %v212_v26 = vpack.c.bf16 %v2016_v25, %v2016_v25  ;;  %v506_v63 = vpack.c.bf16 %v2016_v25, %v1994_v17  ;;  %v2186_v17 = vld [vmem:[%s2426_s3] sm:$0xff]  }
 0x1c7   :  { %1442 = vmatmul.mubr.bf16.vlgmr.msra.gmra.mxu0 %v212_v26 }
 0x1c8   :  { %1466 = vmatpush3.bf16.msra.mxu0 %v1897_v0  ;;  %1481 = vmatprep.mubr.msk.bf16.mxu0 %vm1851_vm0, %v1850_v1 }
 0x1c9   :  { %1467 = vmatprep.subr.bf16.mxu0 %v1850_v1 }
 0x1cc   :  { %1468 = vmatpush3.bf16.msra.mxu0 %v1905_v2 }
 0x1cd   :  { %1469 = vmatprep.subr.bf16.mxu0 %v1850_v1 }
 0x1d0   :  { %1470 = vmatpush3.bf16.msra.mxu0 %v1918_v3 }
 0x1d1   :  { %1471 = vmatprep.subr.bf16.mxu0 %v1850_v1 }
 0x1d4   :  { %1472 = vmatpush3.bf16.msra.mxu0 %v1925_v4 }
 0x1d5   :  { %1473 = vmatprep.subr.bf16.mxu0 %v1850_v1 }
 0x1d8   :  { %1474 = vmatpush3.bf16.msra.mxu0 %v1934_v5 }
 0x1d9   :  { %1475 = vmatprep.subr.bf16.mxu0 %v1850_v1 }
 0x1dc   :  { %1476 = vmatpush3.bf16.msra.mxu0 %v1943_v6 }
 0x1dd   :  { %1477 = vmatprep.subr.bf16.mxu0 %v1850_v1 }
 0x1e0   :  { %1478 = vmatpush3.bf16.msra.mxu0 %v1954_v7 }
 0x1e1   :  { %1479 = vmatprep.subr.bf16.mxu0 %v1850_v1 }
 0x1e4   :  { %1480 = vmatpush3.bf16.msra.mxu0 %v1963_v8 }
 0x1e5   :  { %1505 = vmatprep.subr.bf16.mxu0 %v1850_v1 }
 0x287   :  { %v247_v29 = vpop.f32.mrf.mxu0 }
 0x288   :  { %v253_v30 = vadd.f32 %v247_v29, %v211_v28 }
 0x289   :  { %v1443_v31 = vpop.f32.mrf.mxu0 }
 0x28a   :  { %1796 = vtanh.f32 %v253_v30 }
 0x28b   :  { %v250_v32 = vpop.f32.mrf.mxu0 }
 0x28d   :  { %v1444_v33 = vpop.f32.mrf.mxu0 }
 0x297   :  { %v2041_v34 = vpop.eup %1796 }
 0x298   :  { %v260_v35 = vpack.c.bf16 %v2041_v34, %v2041_v34 }
 0x29a   :  { %1462 = vmatmul.mubr.bf16.vlgmr.msra.gmra.mxu1 %v260_v35 }
 0x29b   :  { %1486 = vmatpush3.bf16.msra.mxu1 %v1897_v0  ;;  %1501 = vmatprep.mubr.msk.bf16.mxu1 %vm1851_vm0, %v1850_v1 }
 0x29c   :  { %1487 = vmatprep.subr.bf16.mxu1 %v1850_v1 }
 0x29f   :  { %1488 = vmatpush3.bf16.msra.mxu1 %v1905_v2 }
 0x2a0   :  { %1489 = vmatprep.subr.bf16.mxu1 %v1850_v1 }
 0x2a3   :  { %1490 = vmatpush3.bf16.msra.mxu1 %v1918_v3 }
 0x2a4   :  { %1491 = vmatprep.subr.bf16.mxu1 %v1850_v1 }
 0x2a7   :  { %1492 = vmatpush3.bf16.msra.mxu1 %v1925_v4 }
 0x2a8   :  { %1493 = vmatprep.subr.bf16.mxu1 %v1850_v1 }
 0x2ab   :  { %1494 = vmatpush3.bf16.msra.mxu1 %v1934_v5 }
 0x2ac   :  { %1495 = vmatprep.subr.bf16.mxu1 %v1850_v1 }
 0x2af   :  { %1496 = vmatpush3.bf16.msra.mxu1 %v1943_v6 }
 0x2b0   :  { %1497 = vmatprep.subr.bf16.mxu1 %v1850_v1 }
 0x2b3   :  { %1498 = vmatpush3.bf16.msra.mxu1 %v1954_v7 }
 0x2b4   :  { %1499 = vmatprep.subr.bf16.mxu1 %v1850_v1 }
 0x2b7   :  { %1500 = vmatpush3.bf16.msra.mxu1 %v1963_v8 }
 0x2b8   :  { %1525 = vmatprep.subr.bf16.mxu1 %v1850_v1 }
 0x35a   :  { %v295_v37 = vpop.f32.mrf.mxu1 }
 0x35b   :  { %v301_v38 = vadd.f32 %v295_v37, %v259_v36  ;;  %v2237_v36 = vld [vmem:[%s2427_s4] ss:$0 sm:$0xff] }
 0x35c   :  { %v1463_v39 = vpop.f32.mrf.mxu1 }
 0x35d   :  { %1798 = vtanh.f32 %v301_v38 }
 0x35e   :  { %v298_v40 = vpop.f32.mrf.mxu1 }
 0x360   :  { %v1464_v41 = vpop.f32.mrf.mxu1 }
 0x36a   :  { %v2063_v42 = vpop.eup %1798 }
 0x36b   :  { %v308_v43 = vpack.c.bf16 %v2063_v42, %v2063_v42 }
 0x36d   :  { %1482 = vmatmul.mubr.bf16.vlgmr.msra.gmra.mxu0 %v308_v43 }
 0x36e   :  { %1506 = vmatpush3.bf16.msra.mxu0 %v1897_v0  ;;  %1521 = vmatprep.mubr.msk.bf16.mxu0 %vm1851_vm0, %v1850_v1 }
 0x36f   :  { %1507 = vmatprep.subr.bf16.mxu0 %v1850_v1 }
 0x372   :  { %1508 = vmatpush3.bf16.msra.mxu0 %v1905_v2 }
 0x373   :  { %1509 = vmatprep.subr.bf16.mxu0 %v1850_v1 }
 0x376   :  { %1510 = vmatpush3.bf16.msra.mxu0 %v1918_v3 }
 0x377   :  { %1511 = vmatprep.subr.bf16.mxu0 %v1850_v1 }
 0x37a   :  { %1512 = vmatpush3.bf16.msra.mxu0 %v1925_v4 }
 0x37b   :  { %1513 = vmatprep.subr.bf16.mxu0 %v1850_v1 }
 0x37e   :  { %1514 = vmatpush3.bf16.msra.mxu0 %v1934_v5 }
 0x37f   :  { %1515 = vmatprep.subr.bf16.mxu0 %v1850_v1 }
 0x382   :  { %1516 = vmatpush3.bf16.msra.mxu0 %v1943_v6 }
 0x383   :  { %1517 = vmatprep.subr.bf16.mxu0 %v1850_v1 }
 0x386   :  { %1518 = vmatpush3.bf16.msra.mxu0 %v1954_v7 }
 0x387   :  { %1519 = vmatprep.subr.bf16.mxu0 %v1850_v1 }
 0x38a   :  { %1520 = vmatpush3.bf16.msra.mxu0 %v1963_v8 }
 0x38b   :  { %1545 = vmatprep.subr.bf16.mxu0 %v1776_v53 }
 0x42d   :  { %v343_v46 = vpop.f32.mrf.mxu0 }
 0x42e   :  { %v349_v47 = vadd.f32 %v343_v46, %v307_v45 }
 0x42f   :  { %v1483_v48 = vpop.f32.mrf.mxu0 }
 0x430   :  { %1800 = vtanh.f32 %v349_v47 }
 0x431   :  { %v346_v49 = vpop.f32.mrf.mxu0 }
 0x433   :  { %v1484_v50 = vpop.f32.mrf.mxu0 }
 0x43d   :  { %v1801_v51 = vpop.eup %1800 }
 0x43e   :  { %v356_v52 = vpack.c.bf16 %v1801_v51, %v1801_v51 }
 0x440   :  { %1502 = vmatmul.mubr.bf16.vlgmr.msra.gmra.mxu1 %v356_v52 }
 0x441   :  { %1526 = vmatpush3.bf16.msra.mxu1 %v1897_v0  ;;  %1541 = vmatprep.mubr.msk.bf16.mxu1 %vm1851_vm0, %v1850_v1  ;;  %v1778_v0 = vld [vmem:[%s2425_s2 + $0x28] sm:$0xff]  }
 0x442   :  { %1527 = vmatprep.subr.bf16.mxu1 %v1850_v1 }
 0x445   :  { %1528 = vmatpush3.bf16.msra.mxu1 %v1905_v2  ;;  %v1779_v2 = vld [vmem:[%s2425_s2 + $0x20] sm:$0xff]  }
 0x446   :  { %1529 = vmatprep.subr.bf16.mxu1 %v1850_v1 }
 0x449   :  { %1530 = vmatpush3.bf16.msra.mxu1 %v1918_v3  ;;  %v1780_v3 = vld [vmem:[%s2425_s2 + $0x18] sm:$0xff]  }
 0x44a   :  { %1531 = vmatprep.subr.bf16.mxu1 %v1850_v1 }
 0x44d   :  { %1532 = vmatpush3.bf16.msra.mxu1 %v1925_v4  ;;  %v1781_v4 = vld [vmem:[%s2425_s2 + $0x10] sm:$0xff]  }
 0x44e   :  { %1533 = vmatprep.subr.bf16.mxu1 %v1850_v1 }
 0x451   :  { %1534 = vmatpush3.bf16.msra.mxu1 %v1934_v5  ;;  %v1782_v5 = vld [vmem:[%s2425_s2 + $0x8] sm:$0xff]  }
 0x452   :  { %1535 = vmatprep.subr.bf16.mxu1 %v1850_v1 }
 0x455   :  { %1536 = vmatpush3.bf16.msra.mxu1 %v1943_v6  ;;  %v1783_v6 = vld [vmem:[%s2425_s2] sm:$0xff]  }
 0x456   :  { %1537 = vmatprep.subr.bf16.mxu1 %v1850_v1 }
 0x459   :  { %1538 = vmatpush3.bf16.msra.mxu1 %v1954_v7  ;;  %v507_v7 = vpack.c.bf16 %v2063_v42, %v2041_v34 }
 0x45a   :  { %1539 = vmatprep.subr.bf16.mxu1 %v1850_v1 }
 0x45d   :  { %1540 = vmatpush3.bf16.msra.mxu1 %v1963_v8 }
 0x45e   :  { %1569 = vmatprep.subr.bf16.mxu1 %v1850_v1 }
 0x500   :  { %v391_v55 = vpop.f32.mrf.mxu1 }
 0x501   :  { %v397_v56 = vadd.f32 %v391_v55, %v355_v54 }
 0x502   :  { %v1503_v57 = vpop.f32.mrf.mxu1 }
 0x503   :  { %1802 = vtanh.f32 %v397_v56 }
 0x504   :  { %v394_v58 = vpop.f32.mrf.mxu1 }
 0x506   :  { %v1504_v59 = vpop.f32.mrf.mxu1 }
 0x510   :  { %v1803_v60 = vpop.eup %1802 }
 0x511   :  { %v404_v61 = vpack.c.bf16 %v1803_v60, %v1803_v60  ;;  %v508_v8 = vpack.c.bf16 %v1803_v60, %v1801_v51 }
 0x513   :  { %1522 = vmatmul.mubr.bf16.vlgmr.msra.gmra.mxu0 %v404_v61 }
 0x514   :  { %1546 = vmatpush3.bf16.msra.mxu0 %v1776_v53  ;;  %1561 = vmatprep.mubr.bf16.mxu0 %v506_v63 }
 0x515   :  { %1547 = vmatprep.subr.bf16.mxu0 %v1777_v62 }
 0x518   :  { %1548 = vmatpush3.bf16.msra.mxu0 %v1777_v62 }
 0x519   :  { %1549 = vmatprep.subr.bf16.mxu0 %v1778_v0 }
 0x51c   :  { %1550 = vmatpush3.bf16.msra.mxu0 %v1778_v0 }
 0x51d   :  { %1551 = vmatprep.subr.bf16.mxu0 %v1779_v2 }
 0x520   :  { %1552 = vmatpush3.bf16.msra.mxu0 %v1779_v2 }
 0x521   :  { %1553 = vmatprep.subr.bf16.mxu0 %v1780_v3 }
 0x524   :  { %1554 = vmatpush3.bf16.msra.mxu0 %v1780_v3 }
 0x525   :  { %1555 = vmatprep.subr.bf16.mxu0 %v1781_v4 }
 0x528   :  { %1556 = vmatpush3.bf16.msra.mxu0 %v1781_v4 }
 0x529   :  { %1557 = vmatprep.subr.bf16.mxu0 %v1782_v5 }
 0x52c   :  { %1558 = vmatpush3.bf16.msra.mxu0 %v1782_v5 }
 0x52d   :  { %1559 = vmatprep.subr.bf16.mxu0 %v1783_v6 }
 0x530   :  { %1560 = vmatpush3.bf16.msra.mxu0 %v1783_v6 }
 0x531   :  { %1589 = vmatprep.subr.bf16.mxu0 %v1850_v1 }
 0x533   :  { %1562 = vmatmul.mubr.bf16.vlgmr.msra.gmra.mxu0 %v507_v7 }
 0x534   :  { %1565 = vmatprep.mubr.bf16.mxu0 %v508_v8  ;;  %1590 = vmatpush3.bf16.msra.mxu0 %v2137_v10 }
 0x535   :  { %1591 = vmatprep.subr.bf16.mxu0 %v1850_v1 }
 0x538   :  { %1592 = vmatpush3.bf16.msra.mxu0 %v2144_v11 }
 0x539   :  { %1593 = vmatprep.subr.bf16.mxu0 %v1850_v1 }
 0x53c   :  { %1594 = vmatpush3.bf16.msra.mxu0 %v2151_v12 }
 0x53d   :  { %1595 = vmatprep.subr.bf16.mxu0 %v1850_v1 }
 0x540   :  { %1596 = vmatpush3.bf16.msra.mxu0 %v2158_v13 }
 0x541   :  { %1597 = vmatprep.subr.bf16.mxu0 %v1850_v1 }
 0x544   :  { %1598 = vmatpush3.bf16.msra.mxu0 %v2165_v14 }
 0x545   :  { %1599 = vmatprep.subr.bf16.mxu0 %v1850_v1 }
 0x548   :  { %1600 = vmatpush3.bf16.msra.mxu0 %v2172_v15 }
 0x549   :  { %1601 = vmatprep.subr.bf16.mxu0 %v1850_v1 }
 0x54c   :  { %1602 = vmatpush3.bf16.msra.mxu0 %v2179_v16 }
 0x54d   :  { %1603 = vmatprep.subr.bf16.mxu0 %v1850_v1 }
 0x550   :  { %1604 = vmatpush3.bf16.msra.mxu0 %v2186_v17 }
 0x551   :  { %1629 = vmatprep.subr.bf16.mxu0 %v1850_v1 }
 0x5d3   :  { %v439_v20 = vpop.f32.mrf.mxu0 }
 0x5d4   :  { %v445_v21 = vadd.f32 %v439_v20, %v403_v19 }
 0x5d5   :  { %v1523_v22 = vpop.f32.mrf.mxu0 }
 0x5d6   :  { %1804 = vtanh.f32 %v445_v21 }
 0x5d7   :  { %v442_v23 = vpop.f32.mrf.mxu0 }
 0x5d9   :  { %v1524_v24 = vpop.f32.mrf.mxu0 }
 0x5e3   :  { %v1805_v25 = vpop.eup %1804 }
 0x5e4   :  { %v452_v26 = vpack.c.bf16 %v1805_v25, %v1805_v25 }
 0x5e6   :  { %1542 = vmatmul.mubr.bf16.vlgmr.msra.gmra.mxu1 %v452_v26 }
 0x5e7   :  { %1570 = vmatpush3.bf16.msra.mxu1 %v2137_v10  ;;  %1585 = vmatprep.mubr.msk.bf16.mxu1 %vm1851_vm0, %v1850_v1 }
 0x5e8   :  { %1571 = vmatprep.subr.bf16.mxu1 %v1850_v1 }
 0x5eb   :  { %1572 = vmatpush3.bf16.msra.mxu1 %v2144_v11 }
 0x5ec   :  { %1573 = vmatprep.subr.bf16.mxu1 %v1850_v1 }
 0x5ef   :  { %1574 = vmatpush3.bf16.msra.mxu1 %v2151_v12 }
 0x5f0   :  { %1575 = vmatprep.subr.bf16.mxu1 %v1850_v1 }
 0x5f3   :  { %1576 = vmatpush3.bf16.msra.mxu1 %v2158_v13  ;;  %v2232_v34 = vpop.f32.mrf.mxu0 }
 0x5f4   :  { %1577 = vmatprep.subr.bf16.mxu1 %v1850_v1  ;;  %v624_v59 = vadd.f32 %v2232_v34, %v2237_v36  ;;  %v1068_v34 = vld [vmem:[%s2428_s5 + $0x48] sm:$0xff] }
 0x5f5   :  { %v615_v35 = vpop.f32.mrf.mxu0 }
 0x5f6   :  { %v616_v37 = vadd.f32 %v2237_v36, %v615_v35 }
 0x5f7   :  { %1578 = vmatpush3.bf16.msra.mxu1 %v2165_v14  ;;  %v1564_v45 = vpop.f32.mrf.mxu0 }
 0x5f8   :  { %1579 = vmatprep.subr.bf16.mxu1 %v1850_v1  ;;  %v627_v4 = vadd.f32 %v1564_v45, %v2237_v36  ;;  %v1066_v45 = vld [vmem:[%s2428_s5 + $0x38] sm:$0xff] }
 0x5f9   :  { %v618_v46 = vpop.f32.mrf.mxu0 }
 0x5fa   :  { %v619_v51 = vadd.f32 %v2237_v36, %v618_v46  ;;  %v1065_v46 = vld [vmem:[%s2428_s5 + $0x30] sm:$0xff] }
 0x5fb   :  { %1580 = vmatpush3.bf16.msra.mxu1 %v2172_v15 }
 0x5fc   :  { %1581 = vmatprep.subr.bf16.mxu1 %v1850_v1 }
 0x5ff   :  { %1582 = vmatpush3.bf16.msra.mxu1 %v2179_v16 }
 0x600   :  { %1583 = vmatprep.subr.bf16.mxu1 %v1850_v1 }
 0x603   :  { %1584 = vmatpush3.bf16.msra.mxu1 %v2186_v17 }
 0x604   :  { %1609 = vmatprep.subr.bf16.mxu1 %v1850_v1 }
 0x606   :  { %1586 = vmatmul.mubr.bf16.vlgmr.msra.gmra.mxu1 %v1852_v9  ;;  %v451_v9 = vunpack.c.h.bf16 %v1192_v18 }
 0x607   :  { %1610 = vmatpush3.bf16.msra.mxu1 %v2137_v10  ;;  %1625 = vmatprep.mubr.msk.bf16.mxu1 %vm1851_vm0, %v1850_v1 }
 0x608   :  { %1611 = vmatprep.subr.bf16.mxu1 %v1850_v1 }
 0x60b   :  { %1612 = vmatpush3.bf16.msra.mxu1 %v2144_v11 }
 0x60c   :  { %1613 = vmatprep.subr.bf16.mxu1 %v1850_v1 }
 0x60f   :  { %1614 = vmatpush3.bf16.msra.mxu1 %v2151_v12 }
 0x610   :  { %1615 = vmatprep.subr.bf16.mxu1 %v1850_v1 }
 0x613   :  { %1616 = vmatpush3.bf16.msra.mxu1 %v2158_v13 }
 0x614   :  { %1617 = vmatprep.subr.bf16.mxu1 %v1850_v1 }
 0x617   :  { %1618 = vmatpush3.bf16.msra.mxu1 %v2165_v14 }
 0x618   :  { %1619 = vmatprep.subr.bf16.mxu1 %v1850_v1 }
 0x61b   :  { %1620 = vmatpush3.bf16.msra.mxu1 %v2172_v15 }
 0x61c   :  { %1621 = vmatprep.subr.bf16.mxu1 %v1850_v1 }
 0x61f   :  { %1622 = vmatpush3.bf16.msra.mxu1 %v2179_v16 }
 0x620   :  { %1623 = vmatprep.subr.bf16.mxu1 %v1850_v1 }
 0x623   :  { %1624 = vmatpush3.bf16.msra.mxu1 %v2186_v17 }
 0x624   :  { %1649 = vmatprep.subr.bf16.mxu1 %v1850_v1 }
 0x6a6   :  { %v487_v27 = vpop.f32.mrf.mxu1 }
 0x6a7   :  { %v493_v28 = vadd.f32 %v487_v27, %v451_v9 }
 0x6a8   :  { %v1543_v29 = vpop.f32.mrf.mxu1 }
 0x6a9   :  { %1806 = vtanh.f32 %v493_v28 }
 0x6aa   :  { %v490_v30 = vpop.f32.mrf.mxu1 }
 0x6ac   :  { %v1544_v31 = vpop.f32.mrf.mxu1 }
 0x6ad   :  { %v1071_v31 = vld [vmem:[%s2428_s5 + $0x60] sm:$0xff] }
 0x6b6   :  { %v1807_v32 = vpop.eup %1806 }
 0x6b7   :  { %v509_v33 = vpack.c.bf16 %v1807_v32, %v1805_v25  ;;  %v1070_v32 = vld [vmem:[%s2428_s5 + $0x58] sm:$0xff] }
 0x6b9   :  { %1566 = vmatmul.mubr.bf16.gmra.mxu0 %v509_v33  ;;  %v1069_v33 = vld [vmem:[%s2428_s5 + $0x50] sm:$0xff] }
 0x6ba   :  { %1605 = vmatprep.mubr.msk.bf16.mxu0 %vm1851_vm0, %v1850_v1 }
 0x6c6   :  { %v739_v38 = vpop.f32.mrf.mxu1 }
 0x6c7   :  { %v745_v39 = vadd.f32 %v739_v38, %v616_v37 }
 0x6c8   :  { %v1587_v40 = vpop.f32.mrf.mxu1 }
 0x6c9   :  { %1808 = vtanh.f32 %v745_v39 }
 0x6ca   :  { %v742_v41 = vpop.f32.mrf.mxu1 }
 0x6cc   :  { %v1588_v42 = vpop.f32.mrf.mxu1 }
 0x6d6   :  { %v1809_v43 = vpop.eup %1808 }
 0x6d7   :  { %v748_v44 = vpack.c.bf16 %v1809_v43, %v1809_v43 }
 0x6d9   :  { %1606 = vmatmul.mubr.bf16.vlgmr.msra.gmra.mxu0 %v748_v44  ;;  %v1067_v44 = vld [vmem:[%s2428_s5 + $0x40] sm:$0xff] }
 0x6da   :  { %1630 = vmatpush3.bf16.msra.mxu0 %v2137_v10  ;;  %1645 = vmatprep.mubr.msk.bf16.mxu0 %vm1851_vm0, %v1850_v1 }
 0x6db   :  { %1631 = vmatprep.subr.bf16.mxu0 %v1850_v1 }
 0x6de   :  { %1632 = vmatpush3.bf16.msra.mxu0 %v2144_v11 }
 0x6df   :  { %1633 = vmatprep.subr.bf16.mxu0 %v1850_v1 }
 0x6e2   :  { %1634 = vmatpush3.bf16.msra.mxu0 %v2151_v12 }
 0x6e3   :  { %1635 = vmatprep.subr.bf16.mxu0 %v1850_v1 }
 0x6e6   :  { %1636 = vmatpush3.bf16.msra.mxu0 %v2158_v13 }
 0x6e7   :  { %1637 = vmatprep.subr.bf16.mxu0 %v1850_v1 }
 0x6ea   :  { %1638 = vmatpush3.bf16.msra.mxu0 %v2165_v14 }
 0x6eb   :  { %1639 = vmatprep.subr.bf16.mxu0 %v1850_v1 }
 0x6ee   :  { %1640 = vmatpush3.bf16.msra.mxu0 %v2172_v15 }
 0x6ef   :  { %1641 = vmatprep.subr.bf16.mxu0 %v1850_v1 }
 0x6f2   :  { %1642 = vmatpush3.bf16.msra.mxu0 %v2179_v16 }
 0x6f3   :  { %1643 = vmatprep.subr.bf16.mxu0 %v1850_v1 }
 0x6f6   :  { %1644 = vmatpush3.bf16.msra.mxu0 %v2186_v17 }
 0x6f7   :  { %1669 = vmatprep.subr.bf16.mxu0 %v1850_v1 }
 0x779   :  { %v2258_v47 = vpop.f32.mrf.mxu0 }
 0x77a   :  { %v640_v35 = vadd.f32 %v2258_v47, %v2237_v36  ;;  %v1064_v47 = vld [vmem:[%s2428_s5 + $0x28] sm:$0xff] }
 0x77b   :  { %v2260_v48 = vpop.f32.mrf.mxu0 }
 0x77c   :  { %v632_v21 = vadd.f32 %v2237_v36, %v2260_v48  ;;  %v1063_v48 = vld [vmem:[%s2428_s5 + $0x20] sm:$0xff] }
 0x77d   :  { %v2262_v49 = vpop.f32.mrf.mxu0 }
 0x77f   :  { %v2264_v50 = vpop.f32.mrf.mxu0 }
 0x799   :  { %v783_v52 = vpop.f32.mrf.mxu0 }
 0x79a   :  { %v789_v53 = vadd.f32 %v783_v52, %v619_v51  ;;  %v1061_v51 = vld [vmem:[%s2428_s5 + $0x10] sm:$0xff]  ;;  %v1060_v52 = vld [vmem:[%s2428_s5 + $0x8] sm:$0xff] }
 0x79b   :  { %v1607_v54 = vpop.f32.mrf.mxu0 }
 0x79c   :  { %1810 = vtanh.f32 %v789_v53  ;;  %v1059_v53 = vld [vmem:[%s2428_s5] sm:$0xff]  ;;  %v643_v54 = vadd.f32 %v2262_v49, %v2237_v36 }
 0x79d   :  { %v786_v55 = vpop.f32.mrf.mxu0 }
 0x79f   :  { %v1608_v56 = vpop.f32.mrf.mxu0 }
 0x7a9   :  { %v1811_v57 = vpop.eup %1810 }
 0x7aa   :  { %v792_v58 = vpack.c.bf16 %v1811_v57, %v1811_v57 }
 0x7ac   :  { %1626 = vmatmul.mubr.bf16.vlgmr.msra.gmra.mxu1 %v792_v58 }
 0x7ad   :  { %1650 = vmatpush3.bf16.msra.mxu1 %v2137_v10  ;;  %1665 = vmatprep.mubr.msk.bf16.mxu1 %vm1851_vm0, %v1850_v1 }
 0x7ae   :  { %1651 = vmatprep.subr.bf16.mxu1 %v1850_v1 }
 0x7b1   :  { %1652 = vmatpush3.bf16.msra.mxu1 %v2144_v11 }
 0x7b2   :  { %1653 = vmatprep.subr.bf16.mxu1 %v1850_v1 }
 0x7b5   :  { %1654 = vmatpush3.bf16.msra.mxu1 %v2151_v12 }
 0x7b6   :  { %1655 = vmatprep.subr.bf16.mxu1 %v1850_v1 }
 0x7b9   :  { %1656 = vmatpush3.bf16.msra.mxu1 %v2158_v13 }
 0x7ba   :  { %1657 = vmatprep.subr.bf16.mxu1 %v1850_v1 }
 0x7bd   :  { %1658 = vmatpush3.bf16.msra.mxu1 %v2165_v14 }
 0x7be   :  { %1659 = vmatprep.subr.bf16.mxu1 %v1850_v1 }
 0x7c1   :  { %1660 = vmatpush3.bf16.msra.mxu1 %v2172_v15 }
 0x7c2   :  { %1661 = vmatprep.subr.bf16.mxu1 %v1850_v1 }
 0x7c5   :  { %1662 = vmatpush3.bf16.msra.mxu1 %v2179_v16 }
 0x7c6   :  { %1663 = vmatprep.subr.bf16.mxu1 %v1850_v1 }
 0x7c9   :  { %1664 = vmatpush3.bf16.msra.mxu1 %v2186_v17 }
 0x7ca   :  { %1689 = vmatprep.subr.bf16.mxu1 %v1850_v1 }
 0x86c   :  { %v827_v60 = vpop.f32.mrf.mxu1 }
 0x86d   :  { %v833_v61 = vadd.f32 %v827_v60, %v624_v59 }
 0x86e   :  { %v1627_v62 = vpop.f32.mrf.mxu1 }
 0x86f   :  { %1812 = vtanh.f32 %v833_v61  ;;  %v1211_v61 = vld [vmem:[%s2429_s6] ss:$0 sm:$0xff] }
 0x870   :  { %v830_v63 = vpop.f32.mrf.mxu1 }
 0x872   :  { %v1628_v0 = vpop.f32.mrf.mxu1 }
 0x87c   :  { %v1813_v2 = vpop.eup %1812 }
 0x87d   :  { %v836_v3 = vpack.c.bf16 %v1813_v2, %v1813_v2 }
 0x87f   :  { %1646 = vmatmul.mubr.bf16.vlgmr.msra.gmra.mxu0 %v836_v3 }
 0x880   :  { %1670 = vmatpush3.bf16.msra.mxu0 %v2137_v10  ;;  %1685 = vmatprep.mubr.msk.bf16.mxu0 %vm1851_vm0, %v1850_v1 }
 0x881   :  { %1671 = vmatprep.subr.bf16.mxu0 %v1850_v1 }
 0x884   :  { %1672 = vmatpush3.bf16.msra.mxu0 %v2144_v11 }
 0x885   :  { %1673 = vmatprep.subr.bf16.mxu0 %v1850_v1 }
 0x888   :  { %1674 = vmatpush3.bf16.msra.mxu0 %v2151_v12 }
 0x889   :  { %1675 = vmatprep.subr.bf16.mxu0 %v1850_v1 }
 0x88c   :  { %1676 = vmatpush3.bf16.msra.mxu0 %v2158_v13 }
 0x88d   :  { %1677 = vmatprep.subr.bf16.mxu0 %v1850_v1 }
 0x890   :  { %1678 = vmatpush3.bf16.msra.mxu0 %v2165_v14 }
 0x891   :  { %1679 = vmatprep.subr.bf16.mxu0 %v1850_v1 }
 0x894   :  { %1680 = vmatpush3.bf16.msra.mxu0 %v2172_v15 }
 0x895   :  { %1681 = vmatprep.subr.bf16.mxu0 %v1850_v1 }
 0x898   :  { %1682 = vmatpush3.bf16.msra.mxu0 %v2179_v16 }
 0x899   :  { %1683 = vmatprep.subr.bf16.mxu0 %v1850_v1 }
 0x89c   :  { %1684 = vmatpush3.bf16.msra.mxu0 %v2186_v17 }
 0x89d   :  { %1709 = vmatprep.subr.bf16.mxu0 %v1850_v1 }
 0x93f   :  { %v871_v5 = vpop.f32.mrf.mxu0 }
 0x940   :  { %v877_v6 = vadd.f32 %v871_v5, %v627_v4 }
 0x941   :  { %v1647_v7 = vpop.f32.mrf.mxu0 }
 0x942   :  { %1814 = vtanh.f32 %v877_v6 }
 0x943   :  { %v874_v8 = vpop.f32.mrf.mxu0 }
 0x945   :  { %v1648_v18 = vpop.f32.mrf.mxu0 }
 0x94f   :  { %v1815_v19 = vpop.eup %1814 }
 0x950   :  { %v880_v20 = vpack.c.bf16 %v1815_v19, %v1815_v19 }
 0x952   :  { %1666 = vmatmul.mubr.bf16.vlgmr.msra.gmra.mxu1 %v880_v20 }
 0x953   :  { %1690 = vmatpush3.bf16.msra.mxu1 %v2137_v10  ;;  %1705 = vmatprep.mubr.msk.bf16.mxu1 %vm1851_vm0, %v1850_v1 }
 0x954   :  { %1691 = vmatprep.subr.bf16.mxu1 %v1850_v1 }
 0x957   :  { %1692 = vmatpush3.bf16.msra.mxu1 %v2144_v11 }
 0x958   :  { %1693 = vmatprep.subr.bf16.mxu1 %v1850_v1 }
 0x95b   :  { %1694 = vmatpush3.bf16.msra.mxu1 %v2151_v12 }
 0x95c   :  { %1695 = vmatprep.subr.bf16.mxu1 %v1850_v1 }
 0x95f   :  { %1696 = vmatpush3.bf16.msra.mxu1 %v2158_v13 }
 0x960   :  { %1697 = vmatprep.subr.bf16.mxu1 %v1850_v1 }
 0x963   :  { %1698 = vmatpush3.bf16.msra.mxu1 %v2165_v14 }
 0x964   :  { %1699 = vmatprep.subr.bf16.mxu1 %v1850_v1 }
 0x967   :  { %1700 = vmatpush3.bf16.msra.mxu1 %v2172_v15 }
 0x968   :  { %1701 = vmatprep.subr.bf16.mxu1 %v1850_v1 }
 0x96b   :  { %1702 = vmatpush3.bf16.msra.mxu1 %v2179_v16 }
 0x96c   :  { %1703 = vmatprep.subr.bf16.mxu1 %v1850_v1 }
 0x96f   :  { %1704 = vmatpush3.bf16.msra.mxu1 %v2186_v17 }
 0x970   :  { %1729 = vmatprep.subr.mxu1 %v1850_v1 }
 0xa12   :  { %v915_v22 = vpop.f32.mrf.mxu1 }
 0xa13   :  { %v921_v23 = vadd.f32 %v915_v22, %v632_v21 }
 0xa14   :  { %v1667_v24 = vpop.f32.mrf.mxu1 }
 0xa15   :  { %1816 = vtanh.f32 %v921_v23 }
 0xa16   :  { %v918_v25 = vpop.f32.mrf.mxu1 }
 0xa18   :  { %v1668_v26 = vpop.f32.mrf.mxu1 }
 0xa22   :  { %v1817_v9 = vpop.eup %1816 }
 0xa23   :  { %v924_v27 = vpack.c.bf16 %v1817_v9, %v1817_v9 }
 0xa25   :  { %1686 = vmatmul.mubr.bf16.vlgmr.msra.gmra.mxu0 %v924_v27 }
 0xa26   :  { %1710 = vmatpush3.bf16.msra.mxu0 %v2137_v10  ;;  %1725 = vmatprep.mubr.msk.bf16.mxu0 %vm1851_vm0, %v1850_v1  ;;  %v635_v10 = vadd.f32 %v2237_v36, %v2264_v50  ;;  %v1062_v50 = vld [vmem:[%s2428_s5 + $0x18] sm:$0xff] }
 0xa27   :  { %1711 = vmatprep.subr.bf16.mxu0 %v1850_v1 }
 0xa2a   :  { %1712 = vmatpush3.bf16.msra.mxu0 %v2144_v11 }
 0xa2b   :  { %1713 = vmatprep.subr.bf16.mxu0 %v1850_v1 }
 0xa2e   :  { %1714 = vmatpush3.bf16.msra.mxu0 %v2151_v12 }
 0xa2f   :  { %1715 = vmatprep.subr.bf16.mxu0 %v1850_v1 }
 0xa32   :  { %1716 = vmatpush3.bf16.msra.mxu0 %v2158_v13 }
 0xa33   :  { %1717 = vmatprep.subr.bf16.mxu0 %v1850_v1 }
 0xa36   :  { %1718 = vmatpush3.bf16.msra.mxu0 %v2165_v14 }
 0xa37   :  { %1719 = vmatprep.subr.bf16.mxu0 %v1850_v1 }
 0xa3a   :  { %1720 = vmatpush3.bf16.msra.mxu0 %v2172_v15  ;;  %v1074_v15 = vld [vmem:[%s2428_s5 + $0x78] sm:$0xff] }
 0xa3b   :  { %1721 = vmatprep.subr.bf16.mxu0 %v1850_v1 }
 0xa3e   :  { %1722 = vmatpush3.bf16.msra.mxu0 %v2179_v16  ;;  %v1073_v16 = vld [vmem:[%s2428_s5 + $0x70] sm:$0xff] }
 0xa3f   :  { %1723 = vmatprep.subr.bf16.mxu0 %v1850_v1 }
 0xa42   :  { %1724 = vmatpush3.bf16.msra.mxu0 %v2186_v17  ;;  %v1072_v17 = vld [vmem:[%s2428_s5 + $0x68] sm:$0xff]  ;;  %s1853_s5 = smov [#allocation5]  }
 0xa43   :  { %s1171_s13 = sshll.u32 %s1853_s5, 4  ;;  %s1172_s13 = int_to_ptr.vmem [resolvable:$true] %s1171_s13 }
 0xa44   :  { %s1828_s6 = scalar_lea.vmem %s1172_s13, 128  ;;  %p1833_p1 = scmp.lt.s32.totalorder %s1172_s13, %s1172_s13 }
 0xa45   :  { %p1829_p0 = scmp.ne.s32.totalorder %s1172_s13, %s1828_s6  ;;  %p1834_p2 = scmp.lt.s32.totalorder %s1828_s6, %s1828_s6 }
 0xa47   :  { %p1835_p3 = por %p1834_p2, %p1833_p1 }
 0xa49   :  { %p1836_p4 = pnand %p1835_p3, %p1829_p0 }
 0xae5   :  { %v959_v11 = vpop.f32.mrf.mxu0 }
 0xae6   :  { %v965_v12 = vadd.f32 %v959_v11, %v635_v10 }
 0xae7   :  { %v1687_v13 = vpop.f32.mrf.mxu0 }
 0xae8   :  { %1818 = vtanh.f32 %v965_v12 }
 0xae9   :  { %v962_v14 = vpop.f32.mrf.mxu0 }
 0xaeb   :  { %v1688_v28 = vpop.f32.mrf.mxu0 }
 0xaf5   :  { %v1819_v29 = vpop.eup %1818 }
 0xaf6   :  { %v968_v30 = vpack.c.bf16 %v1819_v29, %v1819_v29 }
 0xaf8   :  { %1706 = vmatmul.mubr.bf16.vlgmr.msra.gmra.mxu1 %v968_v30 }
 0xaf9   :  { %1761 = vmatprep.mubr.msk.f32.mxu1 %vm1851_vm0, %v1850_v1  ;;  %1730 = vmatpush3.msra.mxu1 %v1074_v15 }
 0xafa   :  { %1731 = vmatprep.subr.mxu1 %v1850_v1 }
 0xafb   :  { %1732 = vmatpush3.msra.mxu1 %v1073_v16 }
 0xafc   :  { %1733 = vmatprep.subr.mxu1 %v1850_v1 }
 0xafd   :  { %1734 = vmatpush3.msra.mxu1 %v1072_v17 }
 0xafe   :  { %1735 = vmatprep.subr.mxu1 %v1850_v1 }
 0xaff   :  { %1736 = vmatpush3.msra.mxu1 %v1071_v31 }
 0xb00   :  { %1737 = vmatprep.subr.mxu1 %v1850_v1 }
 0xb01   :  { %1738 = vmatpush3.msra.mxu1 %v1070_v32 }
 0xb02   :  { %1739 = vmatprep.subr.mxu1 %v1850_v1 }
 0xb03   :  { %1740 = vmatpush3.msra.mxu1 %v1069_v33 }
 0xb04   :  { %1741 = vmatprep.subr.mxu1 %v1850_v1 }
 0xb05   :  { %1742 = vmatpush3.msra.mxu1 %v1068_v34 }
 0xb06   :  { %1743 = vmatprep.subr.mxu1 %v1850_v1 }
 0xb07   :  { %1744 = vmatpush3.msra.mxu1 %v1067_v44 }
 0xb08   :  { %1745 = vmatprep.subr.mxu1 %v1850_v1 }
 0xb09   :  { %1746 = vmatpush3.msra.mxu1 %v1066_v45 }
 0xb0a   :  { %1747 = vmatprep.subr.mxu1 %v1850_v1 }
 0xb0b   :  { %1748 = vmatpush3.msra.mxu1 %v1065_v46 }
 0xb0c   :  { %1749 = vmatprep.subr.mxu1 %v1850_v1 }
 0xb0d   :  { %1750 = vmatpush3.msra.mxu1 %v1064_v47 }
 0xb0e   :  { %1751 = vmatprep.subr.mxu1 %v1850_v1 }
 0xb0f   :  { %1752 = vmatpush3.msra.mxu1 %v1063_v48 }
 0xb10   :  { %1753 = vmatprep.subr.mxu1 %v1850_v1 }
 0xb11   :  { %1754 = vmatpush3.msra.mxu1 %v1062_v50 }
 0xb12   :  { %1755 = vmatprep.subr.mxu1 %v1850_v1 }
 0xb13   :  { %1756 = vmatpush3.msra.mxu1 %v1061_v51 }
 0xb14   :  { %1757 = vmatprep.subr.mxu1 %v1850_v1 }
 0xb15   :  { %1758 = vmatpush3.msra.mxu1 %v1060_v52 }
 0xb16   :  { %1759 = vmatprep.subr.mxu1 %v1850_v1 }
 0xb17   :  { %1760 = vmatpush3.msra.mxu1 %v1059_v53 }
 0xbb8   :  { %v1003_v37 = vpop.f32.mrf.mxu1 }
 0xbb9   :  { %v1009_v38 = vadd.f32 %v1003_v37, %v640_v35 }
 0xbba   :  { %v1707_v39 = vpop.f32.mrf.mxu1 }
 0xbbb   :  { %1820 = vtanh.f32 %v1009_v38 }
 0xbbc   :  { %v1006_v40 = vpop.f32.mrf.mxu1 }
 0xbbe   :  { %v1708_v41 = vpop.f32.mrf.mxu1 }
 0xbc8   :  { %v1821_v42 = vpop.eup %1820 }
 0xbc9   :  { %v1012_v43 = vpack.c.bf16 %v1821_v42, %v1821_v42 }
 0xbcb   :  { %1726 = vmatmul.mubr.bf16.vlgmr.msra.gmra.mxu0 %v1012_v43 }
 0xc8b   :  { %v1047_v55 = vpop.f32.mrf.mxu0 }
 0xc8c   :  { %v1053_v56 = vadd.f32 %v1047_v55, %v643_v54 }
 0xc8d   :  { %v1727_v57 = vpop.f32.mrf.mxu0 }
 0xc8e   :  { %1822 = vtanh.f32 %v1053_v56 }
 0xc8f   :  { %v1050_v58 = vpop.f32.mrf.mxu0 }
 0xc91   :  { %v1728_v59 = vpop.f32.mrf.mxu0 }
 0xc9b   :  { %v1823_v60 = vpop.eup %1822 }
 0xc9c   :  { %1762 = vmatmul.mubr.f32.vlgmr.msra.gmra.mxu1 %v1823_v60 }
 0xd5c   :  { %v1148_v62 = vpop.f32.mrf.mxu1 }
 0xd5d   :  { %v1149_v63 = vadd.f32 %v1211_v61, %v1148_v62 }
 0xd5e   :  { %v1763_v1 = vpop.f32.mrf.mxu1 }
 0xd5f   :  { %v1153_v0 = vsel %vm1152_vm1, %v1149_v63, -inf }
 0xd60   :  { %1154 = vmax.xlane.f32.xlu0 %v1153_v0 }
 0xde9   :  { %v1155_v36 = vpop.xlane.xlu0 %1154 }
 0xdea   :  { %v1156_v49 = vsub.f32 %v1149_v63, %v1155_v36 }
 0xdec   :  { %v1157_v2 = vmul.f32 1.442695, %v1156_v49 }
 0xdee   :  { %1824 = vpow2.f32 %v1157_v2 }
 0xdfb   :  { %v1825_v3 = vpop.eup %1824 }
 0xdfc   :  { %v1159_v4 = vsel %vm1152_vm1, %v1825_v3, 0.0 }
 0xdfd   :  { %1160 = vadd.xlane.f32.xlu0 %v1159_v4 }
 0xe86   :  { %v1161_v5 = vpop.xlane.xlu0 %1160 }
 0xe87   :  { %1826 = vrcp.f32 %v1161_v5 }
 0xe94   :  { %v1827_v6 = vpop.eup %1826 }
 0xe95   :  { %v1163_v7 = vmul.f32 %v1827_v6, %v1825_v3 }
 0xe97   :  { %1164 = vst.msk [vmem:[#allocation5] sm:$0xff] %vm1152_vm1, %v1163_v7 }
 0xe98   :  { %1839 = shalt.err (!%p1836_p4)
}
 0xe99   :  { %1174 = dma.vmem_to_hbm [thread:$0]  %s1172_s13, 128, %s2430_s7, [#allocation6]  }
 0xe9a   :  { %1848 = dma.done.wait [#allocation6], 128  }
 0xe9b   :  { %1849 = vsyncadd [#allocation6], 4294967168 }
 0xe9c   :  { %1178 = vsyncpa [#allocation6], 1 }

// kernel: method_rnn_forward.2
= control target key start
LH: loop header
LB: loop body
LE: loop exit
PB: predicated region body
PF: predicated region fallthrough
CT: control target
= control target key end

     0   :  { %vm786_vm0 = vcmask 1041409   ;;  %vm789_vm1 = vcmask 1042434   ;;  %vm792_vm2 = vcmask 1043459   ;;  %vm795_vm3 = vcmask 1044484   ;;  %s1648_s1 = inlined_call_operand.vmem [shape: bf16[768,128], index: 1, kind: input, shape index: {}]   ;;  %s1649_s0 = inlined_call_operand.vmem [shape: bf16[8,8,768], index: 0, kind: input, shape index: {}]   ;;  %s1650_s2 = inlined_call_operand.vmem [shape: f32[1,128], index: 2, kind: input, shape index: {}]   ;;  %s1651_s3 = inlined_call_operand.vmem [shape: bf16[8,8,128], index: 3, kind: output, shape index: {}]  }
   0x1   :  { %v1171_v0 = vld [vmem:[%s1648_s1 + $0x78] sm:$0xff]   ;;  %v1175_v4 = vld [vmem:[%s1648_s1 + $0x70] sm:$0xff]   ;;  %v1179_v8 = vld [vmem:[%s1648_s1 + $0x68] sm:$0xff]   ;;  %vm798_vm4 = vcmask 1045509   ;;  %vm801_vm5 = vcmask 1046534   ;;  %vm804_vm6 = vcmask 1047559  }
   0x2   :  { %v1172_v1 = vld [vmem:[%s1648_s1 + $0xf8] sm:$0xff]   ;;  %1035 = vmatprep.subr.bf16.mxu0 %v1171_v0  ;;  %v1176_v5 = vld [vmem:[%s1648_s1 + $0xf0] sm:$0xff]   ;;  %v1180_v9 = vld [vmem:[%s1648_s1 + $0xe8] sm:$0xff]  }
   0x3   :  { %v1173_v2 = vld [vmem:[%s1648_s1 + $0x38] sm:$0xff]   ;;  %1075 = vmatprep.subr.bf16.mxu1 %v1172_v1  ;;  %v1177_v6 = vld [vmem:[%s1648_s1 + $0x30] sm:$0xff]   ;;  %v1181_v10 = vld [vmem:[%s1648_s1 + $0x28] sm:$0xff]  }
   0x4   :  { %v1174_v3 = vld [vmem:[%s1648_s1 + $0xb8] sm:$0xff]   ;;  %1036 = vmatpush3.bf16.msra.mxu0 %v1173_v2  ;;  %v1178_v7 = vld [vmem:[%s1648_s1 + $0xb0] sm:$0xff]   ;;  %v1182_v11 = vld [vmem:[%s1648_s1 + $0xa8] sm:$0xff]  }
   0x5   :  { %1076 = vmatpush3.bf16.msra.mxu1 %v1174_v3  ;;  %1037 = vmatprep.subr.bf16.mxu0 %v1175_v4  ;;  %v1183_v12 = vld [vmem:[%s1648_s1 + $0x60] sm:$0xff]   ;;  %v1187_v16 = vld [vmem:[%s1648_s1 + $0x58] sm:$0xff]   ;;  %v1191_v20 = vld [vmem:[%s1648_s1 + $0x50] sm:$0xff]  }
   0x6   :  { %1077 = vmatprep.subr.bf16.mxu1 %v1176_v5  ;;  %v1184_v13 = vld [vmem:[%s1648_s1 + $0xe0] sm:$0xff]   ;;  %v1188_v17 = vld [vmem:[%s1648_s1 + $0xd8] sm:$0xff]   ;;  %v1192_v21 = vld [vmem:[%s1648_s1 + $0xd0] sm:$0xff]  }
   0x7   :  { %v1185_v14 = vld [vmem:[%s1648_s1 + $0x20] sm:$0xff]   ;;  %v1189_v18 = vld [vmem:[%s1648_s1 + $0x18] sm:$0xff]   ;;  %v1193_v22 = vld [vmem:[%s1648_s1 + $0x10] sm:$0xff]  }
   0x8   :  { %1038 = vmatpush3.bf16.msra.mxu0 %v1177_v6  ;;  %v1186_v15 = vld [vmem:[%s1648_s1 + $0xa0] sm:$0xff]   ;;  %v1190_v19 = vld [vmem:[%s1648_s1 + $0x98] sm:$0xff]   ;;  %v1194_v23 = vld [vmem:[%s1648_s1 + $0x90] sm:$0xff]  }
   0x9   :  { %1078 = vmatpush3.bf16.msra.mxu1 %v1178_v7  ;;  %1039 = vmatprep.subr.bf16.mxu0 %v1179_v8  ;;  %v1195_v24 = vld [vmem:[%s1648_s1 + $0x48] sm:$0xff]   ;;  %v1199_v28 = vld [vmem:[%s1648_s1 + $0x40] sm:$0xff]   ;;  %v1209_v36 = vld [vmem:[%s1648_s1 + $0x178] sm:$0xff]  }
   0xa   :  { %1079 = vmatprep.subr.bf16.mxu1 %v1180_v9  ;;  %v1196_v25 = vld [vmem:[%s1648_s1 + $0xc8] sm:$0xff]   ;;  %v1200_v29 = vld [vmem:[%s1648_s1 + $0xc0] sm:$0xff]   ;;  %v1210_v37 = vld [vmem:[%s1648_s1 + $0x138] sm:$0xff]  }
   0xb   :  { %v1197_v26 = vld [vmem:[%s1648_s1 + $0x8] sm:$0xff]   ;;  %v1201_v30 = vld [vmem:[%s1648_s1] sm:$0xff]   ;;  %v1211_v38 = vld [vmem:[%s1648_s1 + $0x170] sm:$0xff]  }
   0xc   :  { %1040 = vmatpush3.bf16.msra.mxu0 %v1181_v10  ;;  %v1198_v27 = vld [vmem:[%s1648_s1 + $0x88] sm:$0xff]   ;;  %v1202_v31 = vld [vmem:[%s1648_s1 + $0x80] sm:$0xff]   ;;  %v1212_v39 = vld [vmem:[%s1648_s1 + $0x130] sm:$0xff]  }
   0xd   :  { %1080 = vmatpush3.bf16.msra.mxu1 %v1182_v11  ;;  %1041 = vmatprep.subr.bf16.mxu0 %v1183_v12  ;;  %v1203_v32 = vld [vmem:[%s1649_s0] ss:$24 sps:$4 sm:$0xff]   ;;  %v1205_v33 = vld [vmem:[%s1649_s0 + $0x4] ss:$24 sps:$4 sm:$0xff]   ;;  %v1213_v40 = vld [vmem:[%s1649_s0 + $0x34] ss:$24 sps:$4 sm:$0xff]  }
   0xe   :  { %1081 = vmatprep.subr.bf16.mxu1 %v1184_v13  ;;  %v1206_v34 = vld [vmem:[%s1649_s0 + $0x8] ss:$24 sps:$4 sm:$0xff]   ;;  %v1208_v35 = vld [vmem:[%s1649_s0 + $0xc] ss:$24 sps:$4 sm:$0xff]   ;;  %582 = vmatprep.mubr.bf16.mxu0 %v1205_v33  ;;  %v1215_v41 = vld [vmem:[%s1649_s0 + $0x3c] ss:$24 sps:$4 sm:$0xff]  }
   0xf   :  { %647 = vmatprep.mubr.bf16.mxu1 %v1208_v35  ;;  %v1217_v42 = vld [vmem:[%s1649_s0 + $0x30] ss:$24 sps:$4 sm:$0xff]   ;;  %v1221_v46 = vld [vmem:[%s1648_s1 + $0x160] sm:$0xff]   ;;  %v1229_v51 = vld [vmem:[%s1648_s1 + $0x158] sm:$0xff]  }
  0x10   :  { %1042 = vmatpush3.bf16.msra.mxu0 %v1185_v14  ;;  %v1218_v43 = vld [vmem:[%s1649_s0 + $0x38] ss:$24 sps:$4 sm:$0xff]   ;;  %v1219_v44 = vld [vmem:[%s1648_s1 + $0x168] sm:$0xff]   ;;  %v1222_v47 = vld [vmem:[%s1648_s1 + $0x120] sm:$0xff]  }
  0x11   :  { %1082 = vmatpush3.bf16.msra.mxu1 %v1186_v15  ;;  %1043 = vmatprep.subr.bf16.mxu0 %v1187_v16  ;;  %v1220_v45 = vld [vmem:[%s1648_s1 + $0x128] sm:$0xff]   ;;  %v1223_v48 = vld [vmem:[%s1649_s0 + $0x64] ss:$24 sps:$4 sm:$0xff]   ;;  %v1227_v50 = vld [vmem:[%s1649_s0 + $0x60] ss:$24 sps:$4 sm:$0xff]  }
  0x12   :  { %1083 = vmatprep.subr.bf16.mxu1 %v1188_v17  ;;  %v1225_v49 = vld [vmem:[%s1649_s0 + $0x6c] ss:$24 sps:$4 sm:$0xff]   ;;  %v1228_v52 = vld [vmem:[%s1649_s0 + $0x68] ss:$24 sps:$4 sm:$0xff]   ;;  %v1230_v53 = vld [vmem:[%s1648_s1 + $0x118] sm:$0xff]  }
  0x13   :  { %v1231_v54 = vld [vmem:[%s1648_s1 + $0x150] sm:$0xff]   ;;  %v1239_v58 = vld [vmem:[%s1648_s1 + $0x148] sm:$0xff]   ;;  %v1241_v62 = vld [vmem:[%s1648_s1 + $0x140] sm:$0xff]  }
  0x14   :  { %1044 = vmatpush3.bf16.msra.mxu0 %v1189_v18  ;;  %v1233_v55 = vld [vmem:[%s1649_s0 + $0x94] ss:$24 sps:$4 sm:$0xff]   ;;  %v1237_v59 = vld [vmem:[%s1649_s0 + $0x90] ss:$24 sps:$4 sm:$0xff]   ;;  %v1242_v1 = vld [vmem:[%s1648_s1 + $0x100] sm:$0xff]  }
  0x15   :  { %1084 = vmatpush3.bf16.msra.mxu1 %v1190_v19  ;;  %1045 = vmatprep.subr.bf16.mxu0 %v1191_v20  ;;  %v1235_v56 = vld [vmem:[%s1649_s0 + $0x9c] ss:$24 sps:$4 sm:$0xff]   ;;  %v1238_v60 = vld [vmem:[%s1649_s0 + $0x98] ss:$24 sps:$4 sm:$0xff]   ;;  %v1240_v61 = vld [vmem:[%s1648_s1 + $0x108] sm:$0xff]  }
  0x16   :  { %1085 = vmatprep.subr.bf16.mxu1 %v1192_v21  ;;  %v1232_v57 = vld [vmem:[%s1648_s1 + $0x110] sm:$0xff]   ;;  %v1249_v4 = vld [vmem:[%s1649_s0 + $0x44] ss:$24 sps:$4 sm:$0xff]   ;;  %v1253_v6 = vld [vmem:[%s1649_s0 + $0x40] ss:$24 sps:$4 sm:$0xff]  }
  0x17   :  { %v1245_v63 = vld [vmem:[%s1649_s0 + $0x14] ss:$24 sps:$4 sm:$0xff]   ;;  %v1243_v2 = vld [vmem:[%s1649_s0 + $0x10] ss:$24 sps:$4 sm:$0xff]   ;;  %v1251_v5 = vld [vmem:[%s1649_s0 + $0xa4] ss:$24 sps:$4 sm:$0xff]  }
  0x18   :  { %1046 = vmatpush3.bf16.msra.mxu0 %v1193_v22  ;;  %v1248_v0 = vld [vmem:[%s1649_s0 + $0x74] ss:$24 sps:$4 sm:$0xff]   ;;  %v1246_v3 = vld [vmem:[%s1649_s0 + $0x70] ss:$24 sps:$4 sm:$0xff]   ;;  %v1254_v7 = vld [vmem:[%s1649_s0 + $0xa0] ss:$24 sps:$4 sm:$0xff]  }
  0x19   :  { %1086 = vmatpush3.bf16.msra.mxu1 %v1194_v23  ;;  %1047 = vmatprep.subr.bf16.mxu0 %v1195_v24 }
  0x1a   :  { %1087 = vmatprep.subr.bf16.mxu1 %v1196_v25 }
  0x1c   :  { %1048 = vmatpush3.bf16.msra.mxu0 %v1197_v26 }
  0x1d   :  { %1088 = vmatpush3.bf16.msra.mxu1 %v1198_v27  ;;  %1049 = vmatprep.subr.bf16.mxu0 %v1199_v28 }
  0x1e   :  { %1089 = vmatprep.subr.bf16.mxu1 %v1200_v29 }
  0x20   :  { %1050 = vmatpush3.bf16.msra.mxu0 %v1201_v30 }
  0x21   :  { %1090 = vmatpush3.bf16.msra.mxu1 %v1202_v31  ;;  %1115 = vmatprep.subr.bf16.mxu0 %v1209_v36 }
  0x22   :  { %1155 = vmatprep.subr.bf16.mxu1 %v1209_v36 }
  0x23   :  { %583 = vmatmul.mubr.bf16.vlgmr.msra.gmra.mxu0 %v1203_v32 }
  0x24   :  { %648 = vmatmul.mubr.bf16.vlgmr.msra.gmra.mxu1 %v1206_v34  ;;  %1116 = vmatpush3.bf16.msra.mxu0 %v1210_v37 }
  0x25   :  { %1163 = vmatpush3.bf16.msra.mxu1 %v1210_v37  ;;  %1117 = vmatprep.subr.bf16.mxu0 %v1211_v38 }
  0x26   :  { %1156 = vmatprep.subr.bf16.mxu1 %v1211_v38  ;;  %590 = vmatprep.mubr.bf16.mxu0 %v1213_v40  ;;  %v939_v38 = vld [vmem:[%s1650_s2] ss:$0 sm:$0xff] }
  0x27   :  { %655 = vmatprep.mubr.bf16.mxu1 %v1215_v41 }
  0x28   :  { %1118 = vmatpush3.bf16.msra.mxu0 %v1212_v39 }
  0x29   :  { %1164 = vmatpush3.bf16.msra.mxu1 %v1212_v39  ;;  %1119 = vmatprep.subr.bf16.mxu0 %v1219_v44 }
  0x2a   :  { %1157 = vmatprep.subr.bf16.mxu1 %v1219_v44 }
  0x2b   :  { %591 = vmatmul.mubr.bf16.gmra.mxu0 %v1217_v42 }
  0x2c   :  { %656 = vmatmul.mubr.bf16.gmra.mxu1 %v1218_v43  ;;  %1120 = vmatpush3.bf16.msra.mxu0 %v1220_v45 }
  0x2d   :  { %1165 = vmatpush3.bf16.msra.mxu1 %v1220_v45  ;;  %1121 = vmatprep.subr.bf16.mxu0 %v1221_v46 }
  0x2e   :  { %1158 = vmatprep.subr.bf16.mxu1 %v1221_v46  ;;  %598 = vmatprep.mubr.bf16.mxu0 %v1223_v48 }
  0x2f   :  { %663 = vmatprep.mubr.bf16.mxu1 %v1225_v49 }
  0x30   :  { %1122 = vmatpush3.bf16.msra.mxu0 %v1222_v47 }
  0x31   :  { %1166 = vmatpush3.bf16.msra.mxu1 %v1222_v47  ;;  %1123 = vmatprep.subr.bf16.mxu0 %v1229_v51 }
  0x32   :  { %1159 = vmatprep.subr.bf16.mxu1 %v1229_v51 }
  0x33   :  { %599 = vmatmul.mubr.bf16.gmra.mxu0 %v1227_v50 }
  0x34   :  { %664 = vmatmul.mubr.bf16.gmra.mxu1 %v1228_v52  ;;  %1124 = vmatpush3.bf16.msra.mxu0 %v1230_v53 }
  0x35   :  { %606 = vmatprep.mubr.bf16.mxu0 %v1233_v55  ;;  %1167 = vmatpush3.bf16.msra.mxu1 %v1230_v53 }
  0x36   :  { %1125 = vmatprep.subr.bf16.mxu0 %v1231_v54  ;;  %1160 = vmatprep.subr.bf16.mxu1 %v1231_v54 }
  0x37   :  { %671 = vmatprep.mubr.bf16.mxu1 %v1235_v56 }
  0x38   :  { %1126 = vmatpush3.bf16.msra.mxu0 %v1232_v57 }
  0x39   :  { %1168 = vmatpush3.bf16.msra.mxu1 %v1232_v57  ;;  %1127 = vmatprep.subr.bf16.mxu0 %v1239_v58 }
  0x3a   :  { %1161 = vmatprep.subr.bf16.mxu1 %v1239_v58 }
  0x3b   :  { %607 = vmatmul.mubr.bf16.gmra.mxu0 %v1237_v59 }
  0x3c   :  { %672 = vmatmul.mubr.bf16.gmra.mxu1 %v1238_v60  ;;  %712 = vmatprep.mubr.bf16.mxu0 %v1245_v63 }
  0x3d   :  { %1128 = vmatpush3.bf16.msra.mxu0 %v1240_v61  ;;  %1169 = vmatpush3.bf16.msra.mxu1 %v1240_v61 }
  0x3e   :  { %1129 = vmatprep.subr.bf16.mxu0 %v1241_v62  ;;  %1162 = vmatprep.subr.bf16.mxu1 %v1241_v62 }
  0x3f   :  { %728 = vmatprep.mubr.bf16.mxu1 %v1248_v0 }
  0x41   :  { %1130 = vmatpush3.bf16.msra.mxu0 %v1242_v1  ;;  %1170 = vmatpush3.bf16.msra.mxu1 %v1242_v1 }
  0x44   :  { %713 = vmatmul.mubr.bf16.vlgmr.msra.gmra.mxu0 %v1243_v2  ;;  %729 = vmatmul.mubr.bf16.vlgmr.msra.gmra.mxu1 %v1246_v3 }
  0x45   :  { %720 = vmatprep.mubr.bf16.mxu0 %v1249_v4  ;;  %736 = vmatprep.mubr.bf16.mxu1 %v1251_v5 }
  0x4c   :  { %721 = vmatmul.mubr.bf16.gmra.mxu0 %v1253_v6  ;;  %737 = vmatmul.mubr.bf16.gmra.mxu1 %v1254_v7 }
  0xe3   :  { %v1051_v8 = vpop.f32.mrf.mxu0 }
  0xe4   :  { %v1091_v9 = vpop.f32.mrf.mxu1 }
  0xe5   :  { %v1052_v10 = vpop.f32.mrf.mxu0 }
  0xe6   :  { %v1092_v11 = vpop.f32.mrf.mxu1  ;;  %v1053_v36 = vadd.f32 %v1052_v10, %v1051_v8 }
  0xe7   :  { %v1054_v12 = vpop.f32.mrf.mxu0  ;;  %v1093_v45 = vadd.f32 %v1092_v11, %v1091_v9 }
  0xe8   :  { %v1094_v13 = vpop.f32.mrf.mxu1  ;;  %v585_v44 = vadd.f32 %v1053_v36, %v939_v38 }
  0xe9   :  { %v1055_v14 = vpop.f32.mrf.mxu0 }
  0xea   :  { %v1095_v15 = vpop.f32.mrf.mxu1  ;;  %v1056_v42 = vadd.f32 %v1055_v14, %v1054_v12  ;;  %v650_v54 = vadd.f32 %v1093_v45, %v585_v44 }
  0xeb   :  { %v1057_v16 = vpop.f32.mrf.mxu0  ;;  %v1096_v59 = vadd.f32 %v1095_v15, %v1094_v13 }
  0xec   :  { %v1097_v17 = vpop.f32.mrf.mxu1  ;;  %v588_v51 = vadd.f32 %v1056_v42, %v939_v38 }
  0xed   :  { %v1058_v18 = vpop.f32.mrf.mxu0 }
  0xee   :  { %v1098_v19 = vpop.f32.mrf.mxu1  ;;  %v1059_v52 = vadd.f32 %v1058_v18, %v1057_v16  ;;  %v653_v4 = vadd.f32 %v1096_v59, %v588_v51 }
  0xef   :  { %v1060_v20 = vpop.f32.mrf.mxu0  ;;  %v1099_v6 = vadd.f32 %v1098_v19, %v1097_v17 }
  0xf0   :  { %v1491_v21 = vpop.f32.mrf.mxu1  ;;  %v593_v5 = vadd.f32 %v1059_v52, %v939_v38 }
  0xf1   :  { %v1061_v22 = vpop.f32.mrf.mxu0 }
  0xf2   :  { %v1493_v23 = vpop.f32.mrf.mxu1  ;;  %v1062_v55 = vadd.f32 %v1061_v22, %v1060_v20 }
  0xf3   :  { %v1063_v24 = vpop.f32.mrf.mxu0 }
  0xf4   :  { %v1103_v25 = vpop.f32.mrf.mxu1  ;;  %v596_v9 = vadd.f32 %v1062_v55, %v939_v38 }
  0xf5   :  { %v1064_v26 = vpop.f32.mrf.mxu0 }
  0xf6   :  { %v1104_v27 = vpop.f32.mrf.mxu1  ;;  %v1065_v39 = vadd.f32 %v1064_v26, %v1063_v24  ;;  %v1102_v26 = vadd.f32 %v1493_v23, %v1491_v21 }
  0xf7   :  { %v1066_v28 = vpop.f32.mrf.mxu0  ;;  %v1105_v48 = vadd.f32 %v1104_v27, %v1103_v25 }
  0xf8   :  { %v1106_v29 = vpop.f32.mrf.mxu1  ;;  %v601_v47 = vadd.f32 %v1065_v39, %v939_v38 }
  0xf9   :  { %v1067_v30 = vpop.f32.mrf.mxu0 }
  0xfa   :  { %v1107_v31 = vpop.f32.mrf.mxu1  ;;  %v1068_v46 = vadd.f32 %v1067_v30, %v1066_v28  ;;  %v666_v60 = vadd.f32 %v1105_v48, %v601_v47  ;;  %v658_v30 = vadd.f32 %v1099_v6, %v593_v5 }
  0xfb   :  { %v1069_v32 = vpop.f32.mrf.mxu0  ;;  %v1108_v0 = vadd.f32 %v1107_v31, %v1106_v29  ;;  %v661_v31 = vadd.f32 %v1102_v26, %v596_v9 }
  0xfc   :  { %v1109_v33 = vpop.f32.mrf.mxu1  ;;  %v604_v56 = vadd.f32 %v1068_v46, %v939_v38 }
  0xfd   :  { %v1070_v34 = vpop.f32.mrf.mxu0 }
  0xfe   :  { %v1110_v35 = vpop.f32.mrf.mxu1  ;;  %v1071_v61 = vadd.f32 %v1070_v34, %v1069_v32  ;;  %v669_v10 = vadd.f32 %v1108_v0, %v604_v56 }
  0xff   :  { %v1072_v37 = vpop.f32.mrf.mxu0  ;;  %v1111_v13 = vadd.f32 %v1110_v35, %v1109_v33 }
 0x100   :  { %v1112_v40 = vpop.f32.mrf.mxu1  ;;  %v609_v16 = vadd.f32 %v1071_v61, %v939_v38 }
 0x101   :  { %v1073_v41 = vpop.f32.mrf.mxu0 }
 0x102   :  { %v1113_v43 = vpop.f32.mrf.mxu1  ;;  %v1074_v1 = vadd.f32 %v1073_v41, %v1072_v37  ;;  %v674_v32 = vadd.f32 %v1111_v13, %v609_v16 }
 0x103   :  { %v1114_v28 = vadd.f32 %v1113_v43, %v1112_v40 }
 0x104   :  { %v1131_v49 = vpop.f32.mrf.mxu0  ;;  %v1143_v50 = vpop.f32.mrf.mxu1  ;;  %v612_v22 = vadd.f32 %v1074_v1, %v939_v38 }
 0x106   :  { %v1132_v53 = vpop.f32.mrf.mxu0  ;;  %v1144_v58 = vpop.f32.mrf.mxu1  ;;  %v677_v35 = vadd.f32 %v1114_v28, %v612_v22 }
 0x107   :  { %v1133_v57 = vadd.f32 %v1132_v53, %v1131_v49  ;;  %v1145_v62 = vadd.f32 %v1144_v58, %v1143_v50 }
 0x108   :  { %v1134_v63 = vpop.f32.mrf.mxu0  ;;  %v1146_v3 = vpop.f32.mrf.mxu1 }
 0x109   :  { %v715_v2 = vadd.f32 %v1133_v57, %v650_v54  ;;  %v731_v7 = vadd.f32 %v1145_v62, %v666_v60 }
 0x10a   :  { %v1135_v8 = vpop.f32.mrf.mxu0  ;;  %v1147_v14 = vpop.f32.mrf.mxu1 }
 0x10b   :  { %v1027_v11 = vpack.c.bf16 %v715_v2, %v715_v2  ;;  %v1136_v12 = vadd.f32 %v1135_v8, %v1134_v63  ;;  %v1031_v15 = vpack.c.bf16 %v731_v7, %v731_v7  ;;  %v1148_v18 = vadd.f32 %v1147_v14, %v1146_v3 }
 0x10c   :  { %v1137_v20 = vpop.f32.mrf.mxu0  ;;  %v1149_v25 = vpop.f32.mrf.mxu1 }
 0x10d   :  { %v1498_v24 = vunpack.c.l.b16 %v1027_v11  ;;  %v718_v17 = vadd.f32 %v1136_v12, %v653_v4  ;;  %v734_v19 = vadd.f32 %v1148_v18, %v669_v10  ;;  %v1502_v33 = vunpack.c.l.b16 %v1031_v15 }
 0x10e   :  { %v1138_v27 = vpop.f32.mrf.mxu0  ;;  %v1150_v29 = vpop.f32.mrf.mxu1 }
 0x10f   :  { %v809_v36 = vrot.slane %v1498_v24, 1  ;;  %v827_v37 = vrot.slane %v1498_v24, 2  ;;  %v845_v38 = vrot.slane %v1498_v24, 3  ;;  %v863_v23 = vrot.slane %v1498_v24, 4 }
 0x110   :  { %v1140_v34 = vpop.f32.mrf.mxu0  ;;  %v1152_v21 = vpop.f32.mrf.mxu1  ;;  %v881_v39 = vrot.slane %v1498_v24, 5  ;;  %v1028_v40 = vpack.c.bf16 %v718_v17, %v718_v17  ;;  %v1032_v41 = vpack.c.bf16 %v734_v19, %v734_v19  ;;  %v899_v43 = vrot.slane %v1498_v24, 6 }
 0x111   :  { %v1139_v44 = vadd.f32 %v1138_v27, %v1137_v20  ;;  %v1151_v45 = vadd.f32 %v1150_v29, %v1149_v25  ;;  %v917_v47 = vrot.slane %v1498_v24, 7  ;;  %v794_v48 = vrot.slane %v1502_v33, 4 }
 0x112   :  { %v1141_v42 = vpop.f32.mrf.mxu0  ;;  %v815_v49 = vrot.slane %v1502_v33, 5  ;;  %v778_v50 = vunpack.c.l.b16 %v1028_v40  ;;  %v833_v51 = vrot.slane %v1502_v33, 6  ;;  %v851_v52 = vrot.slane %v1502_v33, 7  ;;  %v1153_v55 = vpop.f32.mrf.mxu1 }
 0x113   :  { %v1142_v46 = vadd.f32 %v1141_v42, %v1140_v34  ;;  %v888_v53 = vrot.slane %v1502_v33, 1  ;;  %v1516_v54 = vunpack.c.l.b16 %v1032_v41  ;;  %v906_v56 = vrot.slane %v1502_v33, 2 }
 0x114   :  { %v785_v57 = vrot.slane %v778_v50, 7  ;;  %v723_v58 = vadd.f32 %v1139_v44, %v658_v30  ;;  %v739_v59 = vadd.f32 %v1151_v45, %v674_v32  ;;  %v864_v60 = vrot.slane %v778_v50, 3 }
 0x115   :  { %v882_v61 = vrot.slane %v778_v50, 4  ;;  %v900_v62 = vrot.slane %v778_v50, 5  ;;  %v726_v63 = vadd.f32 %v1142_v46, %v661_v31  ;;  %v924_v0 = vrot.slane %v1502_v33, 3 }
 0x116   :  { %v828_v1 = vrot.slane %v778_v50, 1  ;;  %v918_v2 = vrot.slane %v778_v50, 6  ;;  %v1154_v3 = vadd.f32 %v1153_v55, %v1152_v21  ;;  %v787_v4 = vsel %vm786_vm0, %v785_v57, %v1498_v24 }
 0x117   :  { %v810_v5 = vsel %vm786_vm0, %v778_v50, %v809_v36  ;;  %v846_v6 = vrot.slane %v778_v50, 2  ;;  %v797_v7 = vrot.slane %v1516_v54, 3  ;;  %v865_v8 = vsel %vm786_vm0, %v864_v60, %v863_v23 }
 0x118   :  { %v883_v9 = vsel %vm786_vm0, %v882_v61, %v881_v39  ;;  %v817_v10 = vrot.slane %v1516_v54, 4  ;;  %v835_v11 = vrot.slane %v1516_v54, 5  ;;  %v901_v12 = vsel %vm786_vm0, %v900_v62, %v899_v43 }
 0x119   :  { %v1029_v14 = vpack.c.bf16 %v723_v58, %v723_v58  ;;  %v1033_v16 = vpack.c.bf16 %v739_v59, %v739_v59  ;;  %v1030_v13 = vpack.c.bf16 %v726_v63, %v726_v63  ;;  %v919_v15 = vsel %vm786_vm0, %v918_v2, %v917_v47 }
 0x11a   :  { %v853_v18 = vrot.slane %v1516_v54, 6  ;;  %v829_v20 = vsel %vm786_vm0, %v828_v1, %v827_v37  ;;  %v742_v22 = vadd.f32 %v1154_v3, %v677_v35  ;;  %v871_v24 = vrot.slane %v1516_v54, 7 }
 0x11b   :  { %v908_v25 = vrot.slane %v1516_v54, 1  ;;  %v779_v26 = vunpack.c.l.b16 %v1029_v14  ;;  %v1534_v17 = vunpack.c.l.b16 %v1033_v16  ;;  %v926_v19 = vrot.slane %v1516_v54, 2 }
 0x11c   :  { %v780_v27 = vunpack.c.l.b16 %v1030_v13  ;;  %v847_v28 = vsel %vm786_vm0, %v846_v6, %v845_v38  ;;  %v1034_v29 = vpack.c.bf16 %v742_v22, %v742_v22 }
 0x11d   :  { %v788_v30 = vrot.slane %v779_v26, 6  ;;  %v811_v31 = vrot.slane %v779_v26, 7  ;;  %v830_v32 = vsel %vm789_vm1, %v779_v26, %v829_v20  ;;  %v848_v34 = vrot.slane %v779_v26, 1 }
 0x11e   :  { %v866_v35 = vrot.slane %v779_v26, 2  ;;  %v884_v36 = vrot.slane %v779_v26, 3  ;;  %v902_v37 = vrot.slane %v779_v26, 4  ;;  %v920_v21 = vrot.slane %v779_v26, 5 }
 0x11f   :  { %v790_v23 = vsel %vm789_vm1, %v788_v30, %v787_v4  ;;  %v812_v39 = vsel %vm789_vm1, %v811_v31, %v810_v5  ;;  %v800_v40 = vrot.slane %v1534_v17, 2  ;;  %v819_v41 = vrot.slane %v1534_v17, 3 }
 0x120   :  { %v867_v38 = vsel %vm789_vm1, %v866_v35, %v865_v8  ;;  %v885_v42 = vsel %vm789_vm1, %v884_v36, %v883_v9  ;;  %v903_v43 = vsel %vm789_vm1, %v902_v37, %v901_v12  ;;  %v921_v44 = vsel %vm789_vm1, %v920_v21, %v919_v15 }
 0x121   :  { %v837_v45 = vrot.slane %v1534_v17, 4  ;;  %v855_v46 = vrot.slane %v1534_v17, 5  ;;  %v873_v47 = vrot.slane %v1534_v17, 6  ;;  %v891_v50 = vrot.slane %v1534_v17, 7 }
 0x122   :  { %v928_v55 = vrot.slane %v1534_v17, 1  ;;  %v791_v57 = vrot.slane %v780_v27, 5  ;;  %v813_v58 = vrot.slane %v780_v27, 6  ;;  %v831_v59 = vrot.slane %v780_v27, 7 }
 0x123   :  { %v849_v60 = vsel %vm789_vm1, %v848_v34, %v847_v28  ;;  %v868_v61 = vrot.slane %v780_v27, 1  ;;  %v886_v62 = vrot.slane %v780_v27, 2  ;;  %v904_v63 = vrot.slane %v780_v27, 3 }
 0x124   :  { %v793_v1 = vsel %vm792_vm2, %v791_v57, %v790_v23  ;;  %v814_v2 = vsel %vm792_vm2, %v813_v58, %v812_v39  ;;  %v832_v3 = vsel %vm792_vm2, %v831_v59, %v830_v32  ;;  %v850_v4 = vsel %vm792_vm2, %v780_v27, %v849_v60 }
 0x125   :  { %v796_v5 = vsel %vm795_vm3, %v794_v48, %v793_v1  ;;  %v816_v6 = vsel %vm795_vm3, %v815_v49, %v814_v2  ;;  %v834_v8 = vsel %vm795_vm3, %v833_v51, %v832_v3  ;;  %v852_v9 = vsel %vm795_vm3, %v851_v52, %v850_v4 }
 0x126   :  { %v854_v12 = vsel %vm798_vm4, %v853_v18, %v852_v9  ;;  %v869_v14 = vsel %vm792_vm2, %v868_v61, %v867_v38  ;;  %v887_v16 = vsel %vm792_vm2, %v886_v62, %v885_v42  ;;  %v905_v48 = vsel %vm792_vm2, %v904_v63, %v903_v43 }
 0x127   :  { %v870_v13 = vsel %vm795_vm3, %v1502_v33, %v869_v14  ;;  %v889_v49 = vsel %vm795_vm3, %v888_v53, %v887_v16  ;;  %v907_v51 = vsel %vm795_vm3, %v906_v56, %v905_v48  ;;  %v922_v52 = vrot.slane %v780_v27, 4 }
 0x128   :  { %v784_v15 = vunpack.c.l.b16 %v1034_v29  ;;  %v799_v18 = vsel %vm798_vm4, %v797_v7, %v796_v5  ;;  %v818_v20 = vsel %vm798_vm4, %v817_v10, %v816_v6  ;;  %v836_v22 = vsel %vm798_vm4, %v835_v11, %v834_v8 }
 0x129   :  { %v923_v53 = vsel %vm792_vm2, %v922_v52, %v921_v44  ;;  %v802_v26 = vsel %vm801_vm5, %v800_v40, %v799_v18  ;;  %v820_v56 = vsel %vm801_vm5, %v819_v41, %v818_v20  ;;  %v838_v27 = vsel %vm801_vm5, %v837_v45, %v836_v22 }
 0x12a   :  { %v803_v28 = vrot.slane %v784_v15, 1  ;;  %v821_v29 = vrot.slane %v784_v15, 2  ;;  %v839_v30 = vrot.slane %v784_v15, 3  ;;  %v856_v7 = vsel %vm801_vm5, %v855_v46, %v854_v12 }
 0x12b   :  { %v857_v31 = vrot.slane %v784_v15, 4  ;;  %v872_v10 = vsel %vm798_vm4, %v871_v24, %v870_v13  ;;  %v875_v32 = vrot.slane %v784_v15, 5  ;;  %v890_v11 = vsel %vm798_vm4, %v1516_v54, %v889_v49 }
 0x12c   :  { %v805_v34 = vsel %vm804_vm6, %v803_v28, %v802_v26  ;;  %v822_v35 = vsel %vm804_vm6, %v821_v29, %v820_v56  ;;  %v840_v36 = vsel %vm804_vm6, %v839_v30, %v838_v27  ;;  %v874_v37 = vsel %vm801_vm5, %v873_v47, %v872_v10 }
 0x12d   :  { %v806_v21 = vpack.c.b16 %v805_v34, %v805_v34  ;;  %v823_v23 = vpack.c.b16 %v822_v35, %v822_v35  ;;  %v841_v39 = vpack.c.b16 %v840_v36, %v840_v36  ;;  %v858_v40 = vsel %vm804_vm6, %v857_v31, %v856_v7 }
 0x12e   :  { %v859_v41 = vpack.c.b16 %v858_v40, %v858_v40  ;;  %v876_v24 = vsel %vm804_vm6, %v875_v32, %v874_v37  ;;  %v892_v38 = vsel %vm801_vm5, %v891_v50, %v890_v11  ;;  %v893_v42 = vrot.slane %v784_v15, 6 }
 0x12f   :  { %808 = vst [vmem:[%s1651_s3] sm:$0xf] %v806_v21  ;;  %1020 = vst [vmem:[%s1651_s3 + $0x4] sm:$0xf] %v823_v23  ;;  %v877_v43 = vpack.c.b16 %v876_v24, %v876_v24  ;;  %v909_v44 = vsel %vm798_vm4, %v908_v25, %v907_v51  ;;  %v911_v45 = vrot.slane %v784_v15, 7  ;;  %v925_v46 = vsel %vm795_vm3, %v924_v0, %v923_v53 }
 0x130   :  { %1021 = vst [vmem:[%s1651_s3 + $0x8] sm:$0xf] %v841_v39  ;;  %1022 = vst [vmem:[%s1651_s3 + $0xc] sm:$0xf] %v859_v41  ;;  %v894_v47 = vsel %vm804_vm6, %v893_v42, %v892_v38  ;;  %v910_v50 = vsel %vm801_vm5, %v1534_v17, %v909_v44  ;;  %v927_v57 = vsel %vm798_vm4, %v926_v19, %v925_v46 }
 0x131   :  { %1023 = vst [vmem:[%s1651_s3 + $0x10] sm:$0xf] %v877_v43  ;;  %v895_v33 = vpack.c.b16 %v894_v47, %v894_v47  ;;  %v912_v0 = vsel %vm804_vm6, %v911_v45, %v910_v50  ;;  %v929_v25 = vsel %vm801_vm5, %v928_v55, %v927_v57 }
 0x132   :  { %v913_v58 = vpack.c.b16 %v912_v0, %v912_v0  ;;  %v930_v59 = vsel %vm804_vm6, %v784_v15, %v929_v25 }
 0x133   :  { %1024 = vst [vmem:[%s1651_s3 + $0x14] sm:$0xf] %v895_v33  ;;  %v931_v54 = vpack.c.b16 %v930_v59, %v930_v59 }
 0x134   :  { %1025 = vst [vmem:[%s1651_s3 + $0x18] sm:$0xf] %v913_v58 }
 0x135   :  { %1026 = vst [vmem:[%s1651_s3 + $0x1c] sm:$0xf] %v931_v54 }

</bundles_post_ra>
